<compile_context>
chip_gen: v6e
topology: v6e:2x2x1
jax: 0.10.0
libtpu: 0.0.40
codegen_flags: <defaults>
</compile_context>

<pallas_src>
import functools

import jax
import jax.numpy as jnp
from jax import lax
from jax.experimental import pallas as pl
from jax.experimental.pallas import tpu as pltpu


def _round_up(x, m):
    return (x + m - 1) // m * m


def _fused_kernel(r_ref, u0_ref, i0_ref, out_u_ref, out_i_ref,
                  ego_u, ego_i, acc_i, sum_u, sum_i, *, inv_layers):
    """Fused n_layers x (bipartite propagation) + layer mean.

    Grid = (layer, user_row_tile); both axes sequential ("arbitrary") because
    the ego / accumulator / sum state is VMEM-resident across the whole grid.
    """
    l = pl.program_id(0)
    iu = pl.program_id(1)
    n_l = pl.num_programs(0)
    n_iu = pl.num_programs(1)
    tu = r_ref.shape[0]

    ws = l % 2          # ego slot written by layer l
    rs = 1 - ws         # ego slot holding layer l-1 (or the layer-0 seed)

    rows_u = pl.ds(pl.multiple_of(iu * tu, tu), tu)

    # ---- layer-0 seeding: stash the (once-streamed) initial embeddings into
    #      the "previous layer" ego slot so all layers share one code path.
    @pl.when(jnp.logical_and(l == 0, iu == 0))
    def _():
        ego_i[rs] = i0_ref[...]

    @pl.when(l == 0)
    def _():
        ego_u[rs, rows_u, :] = u0_ref[...]

    r = r_ref[...]                       # (tu, item_pad)   bf16
    it_old = ego_i[rs]                   # (item_pad, d)    bf16
    u_old = ego_u[rs, rows_u, :]         # (tu, d)          bf16

    # ---- user-side update: complete in a single MXU dot (K folded in).
    u_new = jnp.dot(r, it_old, preferred_element_type=jnp.float32)
    ego_u[ws, rows_u, :] = u_new.astype(ego_u.dtype)

    @pl.when(l == 0)
    def _():
        sum_u[rows_u, :] = u_new

    @pl.when(l > 0)
    def _():
        sum_u[rows_u, :] += u_new

    # ---- item-side contribution of this user tile: R_tile^T @ u_old
    #      (reuses the same streamed R tile, contracted on its first dim).
    contrib_i = lax.dot_general(
        r, u_old, (((0,), (0,)), ((), ())),
        preferred_element_type=jnp.float32)          # (item_pad, d)

    @pl.when(iu == 0)
    def _():
        acc_i[...] = contrib_i

    @pl.when(iu > 0)
    def _():
        acc_i[...] += contrib_i

    # ---- layer epilogue: item half is complete once all user tiles are done.
    @pl.when(iu == n_iu - 1)
    def _():
        it_new = acc_i[...]
        ego_i[ws] = it_new.astype(ego_i.dtype)

        @pl.when(l == 0)
        def _():
            sum_i[...] = it_new

        @pl.when(l > 0)
        def _():
            sum_i[...] += it_new

        @pl.when(l == n_l - 1)
        def _():
            out_i_ref[...] = (sum_i[...] * inv_layers).astype(out_i_ref.dtype)

    # ---- final-layer output for this user tile (sum already includes u_new).
    @pl.when(l == n_l - 1)
    def _():
        out_u_ref[...] = (sum_u[rows_u, :] * inv_layers).astype(out_u_ref.dtype)


@functools.partial(
    jax.jit, static_argnames=("n_layers", "layer_cl", "tile", "adj_dtype"))
def galore_encoder_forward(norm_adj, user_emb, item_emb, n_layers, layer_cl,
                           *, tile=512, adj_dtype=jnp.bfloat16):
    """Reproduces GALORE_Encoder.forward(perturbed_adj=None, perturbed=False).

    `norm_adj` is the dense symmetric bipartite Laplacian [[0, R], [R^T, 0]]
    (zero user-user / item-item blocks, as built by convert_to_laplacian_mat);
    only its R block is streamed by the kernel.
    Returns (user_all_embeddings, item_all_embeddings).
    """
    del layer_cl  # only relevant for the perturbed=True CL outputs
    user_num, d = user_emb.shape
    item_num = item_emb.shape[0]

    # Tiling / padding geometry: lane dims multiples of 128; user rows padded
    # to a tile multiple so no rows of R are dropped.
    d_pad = _round_up(d, 128)
    item_pad = _round_up(item_num, 128)
    tu = min(tile, _round_up(user_num, 128))
    user_pad = _round_up(user_num, tu)
    n_iu = user_pad // tu

    # Bipartite block of the normalized Laplacian: exactly norm_adj[:U, U:].
    r = norm_adj[:user_num, user_num:].astype(adj_dtype)
    r_p = jnp.zeros((user_pad, item_pad), adj_dtype).at[
        :user_num, :item_num].set(r)
    u0_p = jnp.zeros((user_pad, d_pad), adj_dtype).at[:user_num, :d].set(
        user_emb.astype(adj_dtype))
    i0_p = jnp.zeros((item_pad, d_pad), adj_dtype).at[:item_num, :d].set(
        item_emb.astype(adj_dtype))

    bpe = jnp.dtype(adj_dtype).itemsize
    vmem_needed = (
        2 * tu * item_pad * bpe          # R tiles (double buffered)
        + 2 * tu * d_pad * bpe           # user-embedding tiles
        + 2 * item_pad * d_pad * bpe     # item-embedding block
        + 2 * tu * d_pad * 4             # user output tiles
        + 2 * item_pad * d_pad * 4       # item output block
        + 2 * user_pad * d_pad * bpe     # ego_u ping-pong (bf16)
        + 2 * item_pad * d_pad * bpe     # ego_i ping-pong (bf16)
        + item_pad * d_pad * 4           # per-layer item accumulator
        + user_pad * d_pad * 4           # user layer-sum
        + item_pad * d_pad * 4)          # item layer-sum
    if vmem_needed > (40 << 20):
        raise ValueError(
            "graph too large for the fused VMEM-resident kernel "
            f"({vmem_needed >> 20} MiB needed); reduce `tile` or fall back to "
            "a per-layer kernel with HBM-resident ego embeddings")
    vmem_limit = min(int(vmem_needed * 1.5) + (8 << 20), 56 << 20)

    last = n_layers - 1
    kernel = functools.partial(_fused_kernel, inv_layers=1.0 / n_layers)

    out_u, out_i = pl.pallas_call(
        kernel,
        out_shape=(jax.ShapeDtypeStruct((user_pad, d_pad), jnp.float32),
                   jax.ShapeDtypeStruct((item_pad, d_pad), jnp.float32)),
        grid_spec=pltpu.PrefetchScalarGridSpec(
            num_scalar_prefetch=0,
            grid=(n_layers, n_iu),
            in_specs=[
                # R row-tile (tu, item_pad): streamed once per layer; for small
                # graphs (n_iu == 1) the block index is constant across the
                # whole grid, so R is DMA'd once and stays VMEM-resident.
                pl.BlockSpec((tu, item_pad), lambda l, i: (i, 0)),
                # Initial user embeddings: streamed only during layer 0;
                # pinned to block 0 afterwards (DMA skipped on later layers).
                pl.BlockSpec((tu, d_pad),
                             lambda l, i: (jnp.where(l == 0, i, 0), 0)),
                # Initial item embeddings: one full-array block with a constant
                # index -> DMA'd exactly once.
                pl.BlockSpec((item_pad, d_pad), lambda l, i: (0, 0)),
            ],
            out_specs=(
                # User output tiles only cycle / write back during the final
                # layer (pinned to block 0 before that).
                pl.BlockSpec((tu, d_pad),
                             lambda l, i: (jnp.where(l == last, i, 0), 0)),
                # Item output: single full-array block, written once at the end.
                pl.BlockSpec((item_pad, d_pad), lambda l, i: (0, 0)),
            ),
            scratch_shapes=[
                pltpu.VMEM((2, user_pad, d_pad), adj_dtype),   # ego_u (bf16)
                pltpu.VMEM((2, item_pad, d_pad), adj_dtype),   # ego_i (bf16)
                pltpu.VMEM((item_pad, d_pad), jnp.float32),    # acc_i
                pltpu.VMEM((user_pad, d_pad), jnp.float32),    # sum_u
                pltpu.VMEM((item_pad, d_pad), jnp.float32),    # sum_i
            ],
        ),
        compiler_params=pltpu.CompilerParams(
            # All axes sequential: ego / sum state is single-core VMEM-resident.
            dimension_semantics=("arbitrary", "arbitrary"),
            vmem_limit_bytes=vmem_limit,
        ),
    )(r_p, u0_p, i0_p)

    return out_u[:user_num, :d], out_i[:item_num, :d]


# ---------------------------------------------------------------------------
# Deterministic parameter / data construction (synthetic, no checkpoint load)
# ---------------------------------------------------------------------------
def _xavier_uniform(key, shape, dtype=jnp.float32):
    fan_in, fan_out = shape[1], shape[0]
    limit = jnp.sqrt(6.0 / (fan_in + fan_out))
    return jax.random.uniform(key, shape, dtype, minval=-limit, maxval=limit)


def _build_norm_adj(key, user_num, item_num, density=0.1):
    """Dense symmetric-normalized bipartite Laplacian D^-1/2 A D^-1/2."""
    n = user_num + item_num
    r = (jax.random.uniform(key, (user_num, item_num)) < density).astype(jnp.float32)
    adj = jnp.zeros((n, n), jnp.float32)
    adj = adj.at[:user_num, user_num:].set(r)
    adj = adj.at[user_num:, :user_num].set(r.T)
    deg = adj.sum(axis=1)
    d_inv_sqrt = jnp.where(deg > 0, 1.0 / jnp.sqrt(jnp.maximum(deg, 1e-12)), 0.0)
    return adj * d_inv_sqrt[:, None] * d_inv_sqrt[None, :]


def _reference_forward(norm_adj, user_emb, item_emb, n_layers, layer_cl):
    """Pure-JAX f32 reference mirroring the PyTorch forward (perturbed=False).

    The mean is over the n_layers post-propagation embeddings only (matching
    the PyTorch module, which does not include the layer-0 embeddings).
    """
    del layer_cl
    ego = jnp.concatenate([user_emb, item_emb], axis=0)
    all_embeddings = []
    for _ in range(n_layers):
        ego = norm_adj @ ego
        all_embeddings.append(ego)
    final = jnp.mean(jnp.stack(all_embeddings, axis=1), axis=1)
    u = user_emb.shape[0]
    return final[:u], final[u:]


if __name__ == "__main__":
    # Small synthetic problem consistent with the module's shapes.
    user_num, item_num = 96, 160          # N = 256
    emb_size = 64
    n_layers = 3
    layer_cl = 2

    key = jax.random.PRNGKey(0)
    k_u, k_i, k_adj = jax.random.split(key, 3)
    user_emb = _xavier_uniform(k_u, (user_num, emb_size))
    item_emb = _xavier_uniform(k_i, (item_num, emb_size))
    norm_adj = _build_norm_adj(k_adj, user_num, item_num)

    user_out, item_out = galore_encoder_forward(
        norm_adj, user_emb, item_emb, n_layers=n_layers, layer_cl=layer_cl)
    jax.block_until_ready((user_out, item_out))

    # Correctness check vs. an f32 reference that uses the full dense adjacency
    # (validates the bipartite R-only restructuring).  R and the per-layer ego
    # operands are bf16 (f32 accumulate), so use a correspondingly loose tol.
    ref_user, ref_item = _reference_forward(
        norm_adj, user_emb, item_emb, n_layers, layer_cl)
    assert user_out.shape == (user_num, emb_size)
    assert item_out.shape == (item_num, emb_size)
    assert jnp.allclose(user_out, ref_user, atol=1e-2, rtol=1e-2), (
        float(jnp.max(jnp.abs(user_out - ref_user))))
    assert jnp.allclose(item_out, ref_item, atol=1e-2, rtol=1e-2), (
        float(jnp.max(jnp.abs(item_out - ref_item))))

    print("KERNEL_OK")
</pallas_src>

<mosaic_0001>
module attributes {stable_mosaic.version = 11 : i64} {
  func.func @_fused_kernel(%arg0: i32, %arg1: i32, %arg2: memref<128x256xbf16, #tpu.memory_space<vmem>>, %arg3: memref<128x128xbf16, #tpu.memory_space<vmem>>, %arg4: memref<256x128xbf16, #tpu.memory_space<vmem>>, %arg5: memref<128x128xf32, #tpu.memory_space<vmem>>, %arg6: memref<256x128xf32, #tpu.memory_space<vmem>>, %arg7: memref<2x128x128xbf16, #tpu.memory_space<vmem>>, %arg8: memref<2x256x128xbf16, #tpu.memory_space<vmem>>, %arg9: memref<256x128xf32, #tpu.memory_space<vmem>>, %arg10: memref<128x128xf32, #tpu.memory_space<vmem>>, %arg11: memref<256x128xf32, #tpu.memory_space<vmem>>) attributes {dimension_semantics = [#tpu.dimension_semantics<arbitrary>, #tpu.dimension_semantics<arbitrary>], iteration_bounds = array<i64: 3, 1>, scalar_prefetch = 0 : i64, scratch_operands = 5 : i64, tpu.core_type = #tpu.core_type<tc>, window_params = [{transform_indices = @transform_0, window_bounds = array<i64: 128, 256>}, {transform_indices = @transform_1, window_bounds = array<i64: 128, 128>}, {pipeline_mode = #tpu.pipeline_mode<synchronous>, transform_indices = @transform_2, window_bounds = array<i64: 256, 128>}, {transform_indices = @transform_3, window_bounds = array<i64: 128, 128>}, {pipeline_mode = #tpu.pipeline_mode<synchronous>, transform_indices = @transform_4, window_bounds = array<i64: 256, 128>}]} {
    %c2_i32 = arith.constant 2 : i32
    %c0_i32 = arith.constant 0 : i32
    %0 = arith.cmpi eq, %c2_i32, %c0_i32 : i32
    %c1_i32 = arith.constant 1 : i32
    %1 = arith.select %0, %c1_i32, %c2_i32 : i32
    %2 = arith.remsi %arg0, %1 : i32
    %c0_i32_0 = arith.constant 0 : i32
    %3 = arith.cmpi ne, %2, %c0_i32_0 : i32
    %c0_i32_1 = arith.constant 0 : i32
    %4 = arith.cmpi slt, %2, %c0_i32_1 : i32
    %c0_i32_2 = arith.constant 0 : i32
    %5 = arith.cmpi slt, %1, %c0_i32_2 : i32
    %6 = arith.xori %4, %5 : i1
    %7 = arith.andi %6, %3 : i1
    %8 = arith.addi %2, %1 : i32
    %9 = arith.select %7, %8, %2 : i32
    %c1_i32_3 = arith.constant 1 : i32
    %10 = arith.subi %c1_i32_3, %9 : i32
    %c128_i32 = arith.constant 128 : i32
    %11 = arith.muli %arg1, %c128_i32 : i32
    %12 = tpu.assume_multiple %11, 128 : i32
    %c0_i32_4 = arith.constant 0 : i32
    %13 = arith.cmpi eq, %arg0, %c0_i32_4 : i32
    %c0_i32_5 = arith.constant 0 : i32
    %14 = arith.cmpi eq, %arg1, %c0_i32_5 : i32
    %15 = arith.andi %13, %14 : i1
    %16 = arith.extui %15 : i1 to i32
    %c0_i32_6 = arith.constant 0 : i32
    %17 = arith.cmpi ne, %16, %c0_i32_6 : i32
    scf.if %17 {
      %c0_27 = arith.constant 0 : index
      %c0_28 = arith.constant 0 : index
      %55 = vector.load %arg4[%c0_27, %c0_28] : memref<256x128xbf16, #tpu.memory_space<vmem>>, vector<256x128xbf16>
      %56 = arith.index_cast %10 : i32 to index
      %c0_29 = arith.constant 0 : index
      %c0_30 = arith.constant 0 : index
      %57 = vector.load %arg8[%56, %c0_29, %c0_30] : memref<2x256x128xbf16, #tpu.memory_space<vmem>>, vector<1x256x128xbf16>
      %58 = vector.shape_cast %57 : vector<1x256x128xbf16> to vector<256x128xbf16>
      %59 = vector.shape_cast %55 : vector<256x128xbf16> to vector<1x256x128xbf16>
      tpu.vector_store %arg8[%56, %c0_29, %c0_30], %59 {strides = array<i32>} : memref<2x256x128xbf16, #tpu.memory_space<vmem>>, vector<1x256x128xbf16>,
    } else {
    }
    %c0_i32_7 = arith.constant 0 : i32
    %18 = arith.cmpi eq, %arg0, %c0_i32_7 : i32
    %19 = arith.extui %18 : i1 to i32
    %c0_i32_8 = arith.constant 0 : i32
    %20 = arith.cmpi ne, %19, %c0_i32_8 : i32
    scf.if %20 {
      %c0_27 = arith.constant 0 : index
      %c0_28 = arith.constant 0 : index
      %55 = vector.load %arg3[%c0_27, %c0_28] : memref<128x128xbf16, #tpu.memory_space<vmem>>, vector<128x128xbf16>
      %56 = arith.index_cast %10 : i32 to index
      %57 = arith.index_cast %12 : i32 to index
      %c0_29 = arith.constant 0 : index
      %58 = vector.load %arg7[%56, %57, %c0_29] : memref<2x128x128xbf16, #tpu.memory_space<vmem>>, vector<1x128x128xbf16>
      %59 = vector.shape_cast %58 : vector<1x128x128xbf16> to vector<128x128xbf16>
      %60 = vector.shape_cast %55 : vector<128x128xbf16> to vector<1x128x128xbf16>
      tpu.vector_store %arg7[%56, %57, %c0_29], %60 {strides = array<i32>} : memref<2x128x128xbf16, #tpu.memory_space<vmem>>, vector<1x128x128xbf16>,
    } else {
    }
    %c0 = arith.constant 0 : index
    %c0_9 = arith.constant 0 : index
    %21 = vector.load %arg2[%c0, %c0_9] : memref<128x256xbf16, #tpu.memory_space<vmem>>, vector<128x256xbf16>
    %22 = arith.index_cast %10 : i32 to index
    %c0_10 = arith.constant 0 : index
    %c0_11 = arith.constant 0 : index
    %23 = vector.load %arg8[%22, %c0_10, %c0_11] : memref<2x256x128xbf16, #tpu.memory_space<vmem>>, vector<1x256x128xbf16>
    %24 = vector.shape_cast %23 : vector<1x256x128xbf16> to vector<256x128xbf16>
    %25 = arith.index_cast %10 : i32 to index
    %26 = arith.index_cast %12 : i32 to index
    %c0_12 = arith.constant 0 : index
    %27 = vector.load %arg7[%25, %26, %c0_12] : memref<2x128x128xbf16, #tpu.memory_space<vmem>>, vector<1x128x128xbf16>
    %28 = vector.shape_cast %27 : vector<1x128x128xbf16> to vector<128x128xbf16>
    %cst = arith.constant dense<0.000000e+00> : vector<128x128xf32>
    %29 = tpu.matmul %21, %24, %cst {dimension_numbers = #tpu.dot_dimension_numbers<[1], [0], [0], [1], [0, 0, 1, 1], [], []>} : vector<128x256xbf16>, vector<256x128xbf16>, vector<128x128xf32> -> vector<128x128xf32>
    %30 = arith.truncf %29 : vector<128x128xf32> to vector<128x128xbf16>
    %31 = arith.index_cast %9 : i32 to index
    %32 = arith.index_cast %12 : i32 to index
    %c0_13 = arith.constant 0 : index
    %33 = vector.load %arg7[%31, %32, %c0_13] : memref<2x128x128xbf16, #tpu.memory_space<vmem>>, vector<1x128x128xbf16>
    %34 = vector.shape_cast %33 : vector<1x128x128xbf16> to vector<128x128xbf16>
    %35 = vector.shape_cast %30 : vector<128x128xbf16> to vector<1x128x128xbf16>
    tpu.vector_store %arg7[%31, %32, %c0_13], %35 {strides = array<i32>} : memref<2x128x128xbf16, #tpu.memory_space<vmem>>, vector<1x128x128xbf16>,
    %c0_i32_14 = arith.constant 0 : i32
    %36 = arith.cmpi eq, %arg0, %c0_i32_14 : i32
    %37 = arith.extui %36 : i1 to i32
    %c0_i32_15 = arith.constant 0 : i32
    %38 = arith.cmpi ne, %37, %c0_i32_15 : i32
    scf.if %38 {
      %55 = arith.index_cast %12 : i32 to index
      %c0_27 = arith.constant 0 : index
      %56 = vector.load %arg10[%55, %c0_27] : memref<128x128xf32, #tpu.memory_space<vmem>>, vector<128x128xf32>
      tpu.vector_store %arg10[%55, %c0_27], %29 {strides = array<i32>} : memref<128x128xf32, #tpu.memory_space<vmem>>, vector<128x128xf32>,
    } else {
    }
    %c0_i32_16 = arith.constant 0 : i32
    %39 = arith.cmpi sgt, %arg0, %c0_i32_16 : i32
    %40 = arith.extui %39 : i1 to i32
    %c0_i32_17 = arith.constant 0 : i32
    %41 = arith.cmpi ne, %40, %c0_i32_17 : i32
    scf.if %41 {
      %55 = arith.index_cast %12 : i32 to index
      %c0_27 = arith.constant 0 : index
      %56 = vector.load %arg10[%55, %c0_27] : memref<128x128xf32, #tpu.memory_space<vmem>>, vector<128x128xf32>
      %57 = arith.addf %56, %29 : vector<128x128xf32>
      %58 = arith.index_cast %12 : i32 to index
      %c0_28 = arith.constant 0 : index
      %59 = vector.load %arg10[%58, %c0_28] : memref<128x128xf32, #tpu.memory_space<vmem>>, vector<128x128xf32>
      tpu.vector_store %arg10[%58, %c0_28], %57 {strides = array<i32>} : memref<128x128xf32, #tpu.memory_space<vmem>>, vector<128x128xf32>,
    } else {
    }
    %cst_18 = arith.constant dense<0.000000e+00> : vector<256x128xf32>
    %42 = tpu.matmul %21, %28, %cst_18 {dimension_numbers = #tpu.dot_dimension_numbers<[0], [0], [1], [1], [0, 1, 1, 1], [], []>} : vector<128x256xbf16>, vector<128x128xbf16>, vector<256x128xf32> -> vector<256x128xf32>
    %c0_i32_19 = arith.constant 0 : i32
    %43 = arith.cmpi eq, %arg1, %c0_i32_19 : i32
    %44 = arith.extui %43 : i1 to i32
    %c0_i32_20 = arith.constant 0 : i32
    %45 = arith.cmpi ne, %44, %c0_i32_20 : i32
    scf.if %45 {
      %c0_27 = arith.constant 0 : index
      %c0_28 = arith.constant 0 : index
      %55 = vector.load %arg9[%c0_27, %c0_28] : memref<256x128xf32, #tpu.memory_space<vmem>>, vector<256x128xf32>
      tpu.vector_store %arg9[%c0_27, %c0_28], %42 {strides = array<i32>} : memref<256x128xf32, #tpu.memory_space<vmem>>, vector<256x128xf32>,
    } else {
    }
    %c0_i32_21 = arith.constant 0 : i32
    %46 = arith.cmpi sgt, %arg1, %c0_i32_21 : i32
    %47 = arith.extui %46 : i1 to i32
    %c0_i32_22 = arith.constant 0 : i32
    %48 = arith.cmpi ne, %47, %c0_i32_22 : i32
    scf.if %48 {
      %c0_27 = arith.constant 0 : index
      %c0_28 = arith.constant 0 : index
      %55 = vector.load %arg9[%c0_27, %c0_28] : memref<256x128xf32, #tpu.memory_space<vmem>>, vector<256x128xf32>
      %56 = arith.addf %55, %42 : vector<256x128xf32>
      %c0_29 = arith.constant 0 : index
      %c0_30 = arith.constant 0 : index
      %57 = vector.load %arg9[%c0_29, %c0_30] : memref<256x128xf32, #tpu.memory_space<vmem>>, vector<256x128xf32>
      tpu.vector_store %arg9[%c0_29, %c0_30], %56 {strides = array<i32>} : memref<256x128xf32, #tpu.memory_space<vmem>>, vector<256x128xf32>,
    } else {
    }
    %c0_i32_23 = arith.constant 0 : i32
    %49 = arith.cmpi eq, %arg1, %c0_i32_23 : i32
    %50 = arith.extui %49 : i1 to i32
    %c0_i32_24 = arith.constant 0 : i32
    %51 = arith.cmpi ne, %50, %c0_i32_24 : i32
    scf.if %51 {
      %c0_27 = arith.constant 0 : index
      %c0_28 = arith.constant 0 : index
      %55 = vector.load %arg9[%c0_27, %c0_28] : memref<256x128xf32, #tpu.memory_space<vmem>>, vector<256x128xf32>
      %56 = arith.truncf %55 : vector<256x128xf32> to vector<256x128xbf16>
      %57 = arith.index_cast %9 : i32 to index
      %c0_29 = arith.constant 0 : index
      %c0_30 = arith.constant 0 : index
      %58 = vector.load %arg8[%57, %c0_29, %c0_30] : memref<2x256x128xbf16, #tpu.memory_space<vmem>>, vector<1x256x128xbf16>
      %59 = vector.shape_cast %58 : vector<1x256x128xbf16> to vector<256x128xbf16>
      %60 = vector.shape_cast %56 : vector<256x128xbf16> to vector<1x256x128xbf16>
      tpu.vector_store %arg8[%57, %c0_29, %c0_30], %60 {strides = array<i32>} : memref<2x256x128xbf16, #tpu.memory_space<vmem>>, vector<1x256x128xbf16>,
      %c0_i32_31 = arith.constant 0 : i32
      %61 = arith.cmpi eq, %arg0, %c0_i32_31 : i32
      %62 = arith.extui %61 : i1 to i32
      %c0_i32_32 = arith.constant 0 : i32
      %63 = arith.cmpi ne, %62, %c0_i32_32 : i32
      scf.if %63 {
        %c0_37 = arith.constant 0 : index
        %c0_38 = arith.constant 0 : index
        %70 = vector.load %arg11[%c0_37, %c0_38] : memref<256x128xf32, #tpu.memory_space<vmem>>, vector<256x128xf32>
        tpu.vector_store %arg11[%c0_37, %c0_38], %55 {strides = array<i32>} : memref<256x128xf32, #tpu.memory_space<vmem>>, vector<256x128xf32>,
      } else {
      }
      %c0_i32_33 = arith.constant 0 : i32
      %64 = arith.cmpi sgt, %arg0, %c0_i32_33 : i32
      %65 = arith.extui %64 : i1 to i32
      %c0_i32_34 = arith.constant 0 : i32
      %66 = arith.cmpi ne, %65, %c0_i32_34 : i32
      scf.if %66 {
        %c0_37 = arith.constant 0 : index
        %c0_38 = arith.constant 0 : index
        %70 = vector.load %arg11[%c0_37, %c0_38] : memref<256x128xf32, #tpu.memory_space<vmem>>, vector<256x128xf32>
        %71 = arith.addf %70, %55 : vector<256x128xf32>
        %c0_39 = arith.constant 0 : index
        %c0_40 = arith.constant 0 : index
        %72 = vector.load %arg11[%c0_39, %c0_40] : memref<256x128xf32, #tpu.memory_space<vmem>>, vector<256x128xf32>
        tpu.vector_store %arg11[%c0_39, %c0_40], %71 {strides = array<i32>} : memref<256x128xf32, #tpu.memory_space<vmem>>, vector<256x128xf32>,
      } else {
      }
      %c2_i32_35 = arith.constant 2 : i32
      %67 = arith.cmpi eq, %arg0, %c2_i32_35 : i32
      %68 = arith.extui %67 : i1 to i32
      %c0_i32_36 = arith.constant 0 : i32
      %69 = arith.cmpi ne, %68, %c0_i32_36 : i32
      scf.if %69 {
        %c0_37 = arith.constant 0 : index
        %c0_38 = arith.constant 0 : index
        %70 = vector.load %arg11[%c0_37, %c0_38] : memref<256x128xf32, #tpu.memory_space<vmem>>, vector<256x128xf32>
        %cst_39 = arith.constant 0.333333343 : f32
        %71 = vector.broadcast %cst_39 : f32 to vector<256x128xf32>
        %72 = arith.mulf %70, %71 : vector<256x128xf32>
        %c0_40 = arith.constant 0 : index
        %c0_41 = arith.constant 0 : index
        %73 = vector.load %arg6[%c0_40, %c0_41] : memref<256x128xf32, #tpu.memory_space<vmem>>, vector<256x128xf32>
        tpu.vector_store %arg6[%c0_40, %c0_41], %72 {strides = array<i32>} : memref<256x128xf32, #tpu.memory_space<vmem>>, vector<256x128xf32>,
      } else {
      }
    } else {
    }
    %c2_i32_25 = arith.constant 2 : i32
    %52 = arith.cmpi eq, %arg0, %c2_i32_25 : i32
    %53 = arith.extui %52 : i1 to i32
    %c0_i32_26 = arith.constant 0 : i32
    %54 = arith.cmpi ne, %53, %c0_i32_26 : i32
    scf.if %54 {
      %55 = arith.index_cast %12 : i32 to index
      %c0_27 = arith.constant 0 : index
      %56 = vector.load %arg10[%55, %c0_27] : memref<128x128xf32, #tpu.memory_space<vmem>>, vector<128x128xf32>
      %cst_28 = arith.constant 0.333333343 : f32
      %57 = vector.broadcast %cst_28 : f32 to vector<128x128xf32>
      %58 = arith.mulf %56, %57 : vector<128x128xf32>
      %c0_29 = arith.constant 0 : index
      %c0_30 = arith.constant 0 : index
      %59 = vector.load %arg5[%c0_29, %c0_30] : memref<128x128xf32, #tpu.memory_space<vmem>>, vector<128x128xf32>
      tpu.vector_store %arg5[%c0_29, %c0_30], %58 {strides = array<i32>} : memref<128x128xf32, #tpu.memory_space<vmem>>, vector<128x128xf32>,
    } else {
    }
    return
  }
  func.func @transform_0(%arg0: i32, %arg1: i32) -> (i32, i32) {
    %c0_i32 = arith.constant 0 : i32
    %c0_i32_0 = arith.constant 0 : i32
    return %arg1, %c0_i32 : i32, i32
  }
  func.func @transform_1(%arg0: i32, %arg1: i32) -> (i32, i32) {
    %c0_i32 = arith.constant 0 : i32
    %0 = arith.cmpi eq, %arg0, %c0_i32 : i32
    %c0_i32_0 = arith.constant 0 : i32
    %1 = arith.select %0, %arg1, %c0_i32_0 : i32
    %c0_i32_1 = arith.constant 0 : i32
    %c0_i32_2 = arith.constant 0 : i32
    return %1, %c0_i32_1 : i32, i32
  }
  func.func @transform_2(%arg0: i32, %arg1: i32) -> (i32, i32) {
    %c0_i32 = arith.constant 0 : i32
    %c0_i32_0 = arith.constant 0 : i32
    %c0_i32_1 = arith.constant 0 : i32
    return %c0_i32, %c0_i32_0 : i32, i32
  }
  func.func @transform_3(%arg0: i32, %arg1: i32) -> (i32, i32) {
    %c2_i32 = arith.constant 2 : i32
    %0 = arith.cmpi eq, %arg0, %c2_i32 : i32
    %c0_i32 = arith.constant 0 : i32
    %1 = arith.select %0, %arg1, %c0_i32 : i32
    %c0_i32_0 = arith.constant 0 : i32
    %c0_i32_1 = arith.constant 0 : i32
    return %1, %c0_i32_0 : i32, i32
  }
  func.func @transform_4(%arg0: i32, %arg1: i32) -> (i32, i32) {
    %c0_i32 = arith.constant 0 : i32
    %c0_i32_0 = arith.constant 0 : i32
    %c0_i32_1 = arith.constant 0 : i32
    return %c0_i32, %c0_i32_0 : i32, i32
  }
}

</mosaic_0001>

<bundles_post_ra>
// kernel: galore_encoder_forward.1
= control target key start
LH: loop header
LB: loop body
LE: loop exit
PB: predicated region body
PF: predicated region fallthrough
CT: control target
= control target key end

     0   :  { %s2437_s15 = smov 0   ;;  %s2439_s16 = smov 0   ;;  %s3155_s0 = inlined_call_operand.vmem [shape: bf16[128,256], index: 0, kind: input, shape index: {}]   ;;  %s3156_s1 = inlined_call_operand.vmem [shape: bf16[128,128], index: 1, kind: input, shape index: {}]   ;;  %s3157_s2 = inlined_call_operand.vmem [shape: bf16[256,128], index: 2, kind: input, shape index: {}]   ;;  %s3158_s3 = inlined_call_operand.vmem [shape: f32[128,128], index: 3, kind: output, shape index: {0}]   ;;  %s3159_s4 = inlined_call_operand.vmem [shape: f32[256,128], index: 4, kind: output, shape index: {1}]  }
   0x1   :  { %s2441_s17 = smov 0  }
   0x2 LB: > { %s27_s18 = sadd.s32 1, %s2406_s16  ;;  %p1875_p0 = scmp.ge.s32.totalorder %s2410_s17, 1  ;;  %s2410_s17 = sphi %s2441_s17, %s15_s17   ;;  %s2406_s16 = sphi %s2439_s16, %s3161_s16   ;;  %s2402_s15 = sphi %s2437_s15, %s3160_s15  }
   0x3   : > { %p29_p1 = scmp.ge.s32.totalorder %s27_s18, 3  ;;  %p197_p2 = scmp.lt.s32.totalorder %s2410_s17, 4 }
   0x5   : > { %s3163_s18 = smov (%p29_p1, %s27_s18), 0  ;;  %p198_p3 = pnand %p1875_p0, %p197_p2 }
   0x6   : > { %p261_p4 = scmp.lt.s32.totalorder (!%p198_p3), %s2402_s15, 0  ;;  %s262_s19 = ssub.s32 (!%p198_p3), 0, %s2402_s15 }
   0x7   : > { %201 = sbr.rel (%p198_p3) target bundleno = 811 (0x32b), region = 32  ;;  %s1876_s20 = smin.u32 (!%p198_p3), %s2402_s15, %s262_s19 }
   0x8   : > { %p275_p5 = scmp.eq.s32.totalorder (!%p198_p3), %s2402_s15, 0  ;;  %s264_s21 = sand.u32 (!%p198_p3), 1, %s1876_s20  }
   0x9   : > { %s265_s22 = ssub.s32 (!%p198_p3), 0, %s264_s21 }
   0xc   : > { %s3165_s22 = smov (!%p261_p4, %s265_s22), %s264_s21  ;;  %280 = sbr.rel (!%p275_p5) target bundleno = 27 (0x1b), region = 36  ;;  %v281_v0 = vld [vmem:[%s3157_s2] sm:$0xff] (%p275_p5)   ;;  %v283_v1 = vld [vmem:[%s3157_s2 + $0x8] sm:$0xff] (%p275_p5)   ;;  %v285_v2 = vld [vmem:[%s3157_s2 + $0x10] sm:$0xff] (%p275_p5)  }
   0xd   : > { %p1878_p6 = scmp.lt.s32.totalorder %s3165_s22, 0  ;;  %s271_s23 = sadd.s32 2, %s3165_s22  ;;  %v287_v3 = vld [vmem:[%s3157_s2 + $0x18] sm:$0xff] (%p275_p5)   ;;  %v289_v4 = vld [vmem:[%s3157_s2 + $0x20] sm:$0xff] (%p275_p5)   ;;  %v291_v5 = vld [vmem:[%s3157_s2 + $0x28] sm:$0xff] (%p275_p5)  }
   0xe   : > { %v293_v6 = vld [vmem:[%s3157_s2 + $0x30] sm:$0xff] (%p275_p5)   ;;  %v295_v7 = vld [vmem:[%s3157_s2 + $0x38] sm:$0xff] (%p275_p5)   ;;  %v297_v8 = vld [vmem:[%s3157_s2 + $0x40] sm:$0xff] (%p275_p5)  }
   0xf   : > { %s3167_s23 = smov (!%p1878_p6, %s271_s23), %s3165_s22  ;;  %v299_v9 = vld [vmem:[%s3157_s2 + $0x48] sm:$0xff] (%p275_p5)   ;;  %v301_v10 = vld [vmem:[%s3157_s2 + $0x50] sm:$0xff] (%p275_p5)   ;;  %v303_v11 = vld [vmem:[%s3157_s2 + $0x58] sm:$0xff] (%p275_p5)  }
  0x10   : > { %s2464_s24 = ssub.s32 1, %s3167_s23  ;;  %v305_v12 = vld [vmem:[%s3157_s2 + $0x60] sm:$0xff] (%p275_p5)   ;;  %v307_v13 = vld [vmem:[%s3157_s2 + $0x68] sm:$0xff] (%p275_p5)   ;;  %v309_v14 = vld [vmem:[%s3157_s2 + $0x70] sm:$0xff] (%p275_p5)  }
  0x11   : > { %s1992_s27 = sshll.u32 %s2464_s24, 7  ;;  %v311_v15 = vld [vmem:[%s3157_s2 + $0x78] sm:$0xff]  }
  0x12   : > { %s315_s12 = scalar_lea.vmem [#allocation3], %s1992_s27 }
  0x13   : > { %316 = vst [vmem:[%s315_s12] sm:$0xff] %v281_v0   ;;  %318 = vst [vmem:[%s315_s12 + $0x8] sm:$0xff] %v283_v1  }
  0x14   : > { %320 = vst [vmem:[%s315_s12 + $0x10] sm:$0xff] %v285_v2   ;;  %322 = vst [vmem:[%s315_s12 + $0x18] sm:$0xff] %v287_v3  }
  0x15   : > { %324 = vst [vmem:[%s315_s12 + $0x20] sm:$0xff] %v289_v4   ;;  %326 = vst [vmem:[%s315_s12 + $0x28] sm:$0xff] %v291_v5  }
  0x16   : > { %328 = vst [vmem:[%s315_s12 + $0x30] sm:$0xff] %v293_v6   ;;  %330 = vst [vmem:[%s315_s12 + $0x38] sm:$0xff] %v295_v7  }
  0x17   : > { %332 = vst [vmem:[%s315_s12 + $0x40] sm:$0xff] %v297_v8   ;;  %334 = vst [vmem:[%s315_s12 + $0x48] sm:$0xff] %v299_v9  }
  0x18   : > { %336 = vst [vmem:[%s315_s12 + $0x50] sm:$0xff] %v301_v10   ;;  %338 = vst [vmem:[%s315_s12 + $0x58] sm:$0xff] %v303_v11  }
  0x19   : > { %340 = vst [vmem:[%s315_s12 + $0x60] sm:$0xff] %v305_v12   ;;  %342 = vst [vmem:[%s315_s12 + $0x68] sm:$0xff] %v307_v13  }
  0x1a   : > { %344 = vst [vmem:[%s315_s12 + $0x70] sm:$0xff] %v309_v14   ;;  %346 = vst [vmem:[%s315_s12 + $0x78] sm:$0xff] %v311_v15  }
  0x1b PF: > { %p1882_p7 = scmp.ne.s32.totalorder %s2402_s15, 0 }
  0x1c   : > { %s1993_s20 = sshll.u32 (!%p1882_p7), %s2464_s24, 6 }
  0x1d   : > { %350 = sbr.rel (%p1882_p7) target bundleno = 40 (0x28), region = 40  ;;  %s372_s6 = scalar_lea.vmem (!%p1882_p7), [#allocation2], %s1993_s20 }
  0x22   : > { %v351_v16 = vld [vmem:[%s3156_s1] sm:$0xff]   ;;  %v353_v17 = vld [vmem:[%s3156_s1 + $0x8] sm:$0xff]   ;;  %v355_v18 = vld [vmem:[%s3156_s1 + $0x10] sm:$0xff]  }
  0x23   : > { %v357_v19 = vld [vmem:[%s3156_s1 + $0x18] sm:$0xff]   ;;  %v359_v20 = vld [vmem:[%s3156_s1 + $0x20] sm:$0xff]   ;;  %v361_v21 = vld [vmem:[%s3156_s1 + $0x28] sm:$0xff]   ;;  %373 = vst [vmem:[%s372_s6] sm:$0xff] %v351_v16  }
  0x24   : > { %375 = vst [vmem:[%s372_s6 + $0x8] sm:$0xff] %v353_v17   ;;  %377 = vst [vmem:[%s372_s6 + $0x10] sm:$0xff] %v355_v18   ;;  %v363_v22 = vld [vmem:[%s3156_s1 + $0x30] sm:$0xff]   ;;  %v365_v23 = vld [vmem:[%s3156_s1 + $0x38] sm:$0xff]  }
  0x25   : > { %379 = vst [vmem:[%s372_s6 + $0x18] sm:$0xff] %v357_v19   ;;  %381 = vst [vmem:[%s372_s6 + $0x20] sm:$0xff] %v359_v20  }
  0x26   : > { %383 = vst [vmem:[%s372_s6 + $0x28] sm:$0xff] %v361_v21   ;;  %385 = vst [vmem:[%s372_s6 + $0x30] sm:$0xff] %v363_v22  }
  0x27   : > { %387 = vst [vmem:[%s372_s6 + $0x38] sm:$0xff] %v365_v23  }
  0x28 PF: > { %s1994_s11 = sshll.u32 %s2464_s24, 7  ;;  %v2547_v24 = vld [vmem:[%s3155_s0 + $0x4] ss:$8 sps:$4 sm:$0xff]   ;;  %v2571_v41 = vld [vmem:[%s3155_s0] ss:$8 sps:$4 sm:$0xff]   ;;  %s1995_s5 = sshll.u32 %s2464_s24, 6 }
  0x29   : > { %s2549_s19 = scalar_lea.vmem [#allocation3], %s1994_s11  ;;  %670 = vmatprep.mubr.bf16.mxu0 %v2547_v24  ;;  %v2576_v42 = vld [vmem:[%s3155_s0 + $0x14] ss:$8 sps:$4 sm:$0xff]   ;;  %v2583_v43 = vld [vmem:[%s3155_s0 + $0x10] ss:$8 sps:$4 sm:$0xff]   ;;  %s445_s6 = scalar_lea.vmem [#allocation2], %s1995_s5 }
  0x2a   : > { %v2348_v25 = vld [vmem:[%s2549_s19 + $0x78] sm:$0xff]   ;;  %v2350_v27 = vld [vmem:[%s2549_s19 + $0x70] sm:$0xff]   ;;  %v2352_v29 = vld [vmem:[%s2549_s19 + $0x68] sm:$0xff]   ;;  %s2012_s24 = sshll.u32 %s3167_s23, 6 }
  0x2b   : > { %v2349_v26 = vld [vmem:[%s2549_s19 + $0x38] sm:$0xff]   ;;  %2188 = vmatprep.subr.bf16.mxu0 %v2348_v25  ;;  %v2351_v28 = vld [vmem:[%s2549_s19 + $0x30] sm:$0xff]   ;;  %v2353_v30 = vld [vmem:[%s2549_s19 + $0x28] sm:$0xff]   ;;  %s2698_s7 = scalar_lea.vmem [#allocation2], %s2012_s24 }
  0x2c   : > { %2189 = vmatpush3.bf16.msra.mxu0 %v2349_v26  ;;  %v2354_v31 = vld [vmem:[%s2549_s19 + $0x60] sm:$0xff]   ;;  %v2356_v33 = vld [vmem:[%s2549_s19 + $0x58] sm:$0xff]   ;;  %v2358_v35 = vld [vmem:[%s2549_s19 + $0x50] sm:$0xff]  }
  0x2d   : > { %2190 = vmatprep.subr.bf16.mxu0 %v2350_v27  ;;  %v2355_v32 = vld [vmem:[%s2549_s19 + $0x20] sm:$0xff]   ;;  %v2357_v34 = vld [vmem:[%s2549_s19 + $0x18] sm:$0xff]   ;;  %v2359_v36 = vld [vmem:[%s2549_s19 + $0x10] sm:$0xff]  }
  0x2e   : > { %v2360_v37 = vld [vmem:[%s2549_s19 + $0x48] sm:$0xff]   ;;  %v2362_v39 = vld [vmem:[%s2549_s19 + $0x40] sm:$0xff]   ;;  %v2600_v46 = vld [vmem:[%s3155_s0 + $0x34] ss:$8 sps:$4 sm:$0xff]  }
  0x2f   : > { %v2361_v38 = vld [vmem:[%s2549_s19 + $0x8] sm:$0xff]   ;;  %v2363_v40 = vld [vmem:[%s2549_s19] sm:$0xff]   ;;  %v2607_v47 = vld [vmem:[%s3155_s0 + $0x30] ss:$8 sps:$4 sm:$0xff]  }
  0x30   : > { %2191 = vmatpush3.bf16.msra.mxu0 %v2351_v28  ;;  %v2588_v44 = vld [vmem:[%s3155_s0 + $0x24] ss:$8 sps:$4 sm:$0xff]   ;;  %v2595_v45 = vld [vmem:[%s3155_s0 + $0x20] ss:$8 sps:$4 sm:$0xff]   ;;  %v2624_v50 = vld [vmem:[%s3155_s0 + $0x54] ss:$8 sps:$4 sm:$0xff]  }
  0x31   : > { %2192 = vmatprep.subr.bf16.mxu0 %v2352_v29  ;;  %v2612_v48 = vld [vmem:[%s3155_s0 + $0x44] ss:$8 sps:$4 sm:$0xff]   ;;  %v2619_v49 = vld [vmem:[%s3155_s0 + $0x40] ss:$8 sps:$4 sm:$0xff]   ;;  %v2631_v51 = vld [vmem:[%s3155_s0 + $0x50] ss:$8 sps:$4 sm:$0xff]  }
  0x32   : > { %v2636_v52 = vld [vmem:[%s3155_s0 + $0x64] ss:$8 sps:$4 sm:$0xff]   ;;  %v2643_v53 = vld [vmem:[%s3155_s0 + $0x60] ss:$8 sps:$4 sm:$0xff]   ;;  %v2648_v54 = vld [vmem:[%s3155_s0 + $0x74] ss:$8 sps:$4 sm:$0xff]  }
  0x33   : > { %v2655_v55 = vld [vmem:[%s3155_s0 + $0x70] ss:$8 sps:$4 sm:$0xff]   ;;  %v2659_v56 = vld [vmem:[%s445_s6] sm:$0xf]  ;;  %v2661_v57 = vld [vmem:[%s445_s6 + $0x4] sm:$0xf] }
  0x34   : > { %2193 = vmatpush3.bf16.msra.mxu0 %v2353_v30  ;;  %v2663_v58 = vld [vmem:[%s445_s6 + $0x8] sm:$0xf]  ;;  %v2665_v59 = vld [vmem:[%s445_s6 + $0xc] sm:$0xf]  ;;  %v2667_v60 = vld [vmem:[%s445_s6 + $0x10] sm:$0xf] }
  0x35   : > { %2194 = vmatprep.subr.bf16.mxu0 %v2354_v31  ;;  %v2669_v61 = vld [vmem:[%s445_s6 + $0x14] sm:$0xf]  ;;  %v2671_v62 = vld [vmem:[%s445_s6 + $0x18] sm:$0xf]  ;;  %v2673_v63 = vld [vmem:[%s445_s6 + $0x1c] sm:$0xf] }
  0x36   : > { %v2675_v0 = vld [vmem:[%s445_s6 + $0x20] sm:$0xf]  ;;  %v2677_v1 = vld [vmem:[%s445_s6 + $0x24] sm:$0xf]  ;;  %v2679_v2 = vld [vmem:[%s445_s6 + $0x28] sm:$0xf] }
  0x37   : > { %v2681_v3 = vld [vmem:[%s445_s6 + $0x2c] sm:$0xf]  ;;  %v2683_v4 = vld [vmem:[%s445_s6 + $0x30] sm:$0xf]  ;;  %v2685_v5 = vld [vmem:[%s445_s6 + $0x34] sm:$0xf] }
  0x38   : > { %2195 = vmatpush3.bf16.msra.mxu0 %v2355_v32  ;;  %v2687_v6 = vld [vmem:[%s445_s6 + $0x38] sm:$0xf]  ;;  %v2689_v7 = vld [vmem:[%s445_s6 + $0x3c] sm:$0xf] }
  0x39   : > { %2196 = vmatprep.subr.bf16.mxu0 %v2356_v33 }
  0x3c   : > { %2197 = vmatpush3.bf16.msra.mxu0 %v2357_v34 }
  0x3d   : > { %2198 = vmatprep.subr.bf16.mxu0 %v2358_v35 }
  0x40   : > { %2199 = vmatpush3.bf16.msra.mxu0 %v2359_v36 }
  0x41   : > { %2200 = vmatprep.subr.bf16.mxu0 %v2360_v37 }
  0x44   : > { %2201 = vmatpush3.bf16.msra.mxu0 %v2361_v38 }
  0x45   : > { %2202 = vmatprep.subr.bf16.mxu0 %v2362_v39 }
  0x48   : > { %2203 = vmatpush3.bf16.msra.mxu0 %v2363_v40 }
  0x4b   : > { %671 = vmatmul.mubr.bf16.vlgmr.msra.gmra.mxu0 %v2571_v41 }
  0x4c   : > { %678 = vmatprep.mubr.bf16.mxu0 %v2576_v42 }
  0x53   : > { %679 = vmatmul.mubr.bf16.gmra.mxu0 %v2583_v43 }
  0x54   : > { %686 = vmatprep.mubr.bf16.mxu0 %v2588_v44 }
  0x5b   : > { %687 = vmatmul.mubr.bf16.gmra.mxu0 %v2595_v45 }
  0x5c   : > { %694 = vmatprep.mubr.bf16.mxu0 %v2600_v46 }
  0x63   : > { %695 = vmatmul.mubr.bf16.gmra.mxu0 %v2607_v47 }
  0x64   : > { %702 = vmatprep.mubr.bf16.mxu0 %v2612_v48 }
  0x6b   : > { %703 = vmatmul.mubr.bf16.gmra.mxu0 %v2619_v49 }
  0x6c   : > { %710 = vmatprep.mubr.bf16.mxu0 %v2624_v50 }
  0x73   : > { %711 = vmatmul.mubr.bf16.gmra.mxu0 %v2631_v51 }
  0x74   : > { %718 = vmatprep.mubr.bf16.mxu0 %v2636_v52 }
  0x7b   : > { %719 = vmatmul.mubr.bf16.gmra.mxu0 %v2643_v53 }
  0x7c   : > { %726 = vmatprep.mubr.bf16.mxu0 %v2648_v54 }
  0x83   : > { %727 = vmatmul.mubr.bf16.gmra.mxu0 %v2655_v55 }
 0x10b   : > { %v2204_v8 = vpop.f32.mrf.mxu0 }
 0x10d   : > { %v2205_v9 = vpop.f32.mrf.mxu0 }
 0x10e   : > { %v2692_v12 = vadd.f32 %v2205_v9, %v2204_v8 }
 0x10f   : > { %v2207_v10 = vpop.f32.mrf.mxu0 }
 0x111   : > { %v2208_v11 = vpop.f32.mrf.mxu0 }
 0x112   : > { %v2694_v13 = vadd.f32 %v2208_v11, %v2207_v10 }
 0x113   : > { %v2210_v14 = vpop.f32.mrf.mxu0 }
 0x114   : > { %v2049_v15 = vpack.c.bf16 %v2694_v13, %v2692_v12 }
 0x115   : > { %v2211_v16 = vpop.f32.mrf.mxu0 }
 0x116   : > { %2050 = vst [vmem:[%s2698_s7] sm:$0xff] %v2049_v15   ;;  %v2701_v19 = vadd.f32 %v2211_v16, %v2210_v14 }
 0x117   : > { %v2213_v17 = vpop.f32.mrf.mxu0 }
 0x119   : > { %v2214_v18 = vpop.f32.mrf.mxu0 }
 0x11a   : > { %v2703_v20 = vadd.f32 %v2214_v18, %v2213_v17 }
 0x11b   : > { %v2216_v21 = vpop.f32.mrf.mxu0 }
 0x11c   : > { %v2054_v22 = vpack.c.bf16 %v2703_v20, %v2701_v19 }
 0x11d   : > { %v2217_v23 = vpop.f32.mrf.mxu0 }
 0x11e   : > { %2166 = vst [vmem:[%s2698_s7 + $0x8] sm:$0xff] %v2054_v22   ;;  %v2708_v27 = vadd.f32 %v2217_v23, %v2216_v21 }
 0x11f   : > { %v2219_v25 = vpop.f32.mrf.mxu0 }
 0x121   : > { %v2220_v26 = vpop.f32.mrf.mxu0 }
 0x122   : > { %v2710_v28 = vadd.f32 %v2220_v26, %v2219_v25 }
 0x123   : > { %v2222_v29 = vpop.f32.mrf.mxu0 }
 0x124   : > { %v2059_v30 = vpack.c.bf16 %v2710_v28, %v2708_v27 }
 0x125   : > { %v2223_v31 = vpop.f32.mrf.mxu0 }
 0x126   : > { %2167 = vst [vmem:[%s2698_s7 + $0x10] sm:$0xff] %v2059_v30   ;;  %v2715_v34 = vadd.f32 %v2223_v31, %v2222_v29 }
 0x127   : > { %v2225_v32 = vpop.f32.mrf.mxu0 }
 0x129   : > { %v2226_v33 = vpop.f32.mrf.mxu0 }
 0x12a   : > { %v2717_v35 = vadd.f32 %v2226_v33, %v2225_v32 }
 0x12b   : > { %v2228_v36 = vpop.f32.mrf.mxu0 }
 0x12c   : > { %v2064_v37 = vpack.c.bf16 %v2717_v35, %v2715_v34 }
 0x12d   : > { %v2229_v38 = vpop.f32.mrf.mxu0 }
 0x12e   : > { %2168 = vst [vmem:[%s2698_s7 + $0x18] sm:$0xff] %v2064_v37   ;;  %v2722_v8 = vadd.f32 %v2229_v38, %v2228_v36 }
 0x12f   : > { %v2231_v39 = vpop.f32.mrf.mxu0 }
 0x131   : > { %v2232_v40 = vpop.f32.mrf.mxu0 }
 0x132   : > { %v2724_v9 = vadd.f32 %v2232_v40, %v2231_v39 }
 0x133   : > { %v2234_v10 = vpop.f32.mrf.mxu0 }
 0x134   : > { %v2069_v11 = vpack.c.bf16 %v2724_v9, %v2722_v8 }
 0x135   : > { %v2235_v14 = vpop.f32.mrf.mxu0 }
 0x136   : > { %2169 = vst [vmem:[%s2698_s7 + $0x20] sm:$0xff] %v2069_v11   ;;  %v2729_v17 = vadd.f32 %v2235_v14, %v2234_v10 }
 0x137   : > { %v2237_v15 = vpop.f32.mrf.mxu0 }
 0x139   : > { %v2238_v16 = vpop.f32.mrf.mxu0 }
 0x13a   : > { %v2731_v18 = vadd.f32 %v2238_v16, %v2237_v15 }
 0x13b   : > { %v2240_v21 = vpop.f32.mrf.mxu0 }
 0x13c   : > { %v2074_v22 = vpack.c.bf16 %v2731_v18, %v2729_v17 }
 0x13d   : > { %v2241_v23 = vpop.f32.mrf.mxu0 }
 0x13e   : > { %2170 = vst [vmem:[%s2698_s7 + $0x28] sm:$0xff] %v2074_v22   ;;  %v2736_v29 = vadd.f32 %v2241_v23, %v2240_v21 }
 0x13f   : > { %v2243_v25 = vpop.f32.mrf.mxu0 }
 0x141   : > { %v2244_v26 = vpop.f32.mrf.mxu0 }
 0x142   : > { %v2738_v30 = vadd.f32 %v2244_v26, %v2243_v25 }
 0x143   : > { %v2246_v31 = vpop.f32.mrf.mxu0 }
 0x144   : > { %v2079_v32 = vpack.c.bf16 %v2738_v30, %v2736_v29 }
 0x145   : > { %v2247_v33 = vpop.f32.mrf.mxu0 }
 0x146   : > { %2171 = vst [vmem:[%s2698_s7 + $0x30] sm:$0xff] %v2079_v32   ;;  %v2248_v38 = vadd.f32 %v2247_v33, %v2246_v31 }
 0x147   : > { %v2249_v36 = vpop.f32.mrf.mxu0 }
 0x149   : > { %v2250_v37 = vpop.f32.mrf.mxu0 }
 0x14a   : > { %v2743_v39 = vadd.f32 %v2250_v37, %v2249_v36  ;;  %821 = sbr.rel (%p1882_p7) target bundleno = 343 (0x157), region = 44 }
 0x14c   : > { %v2084_v40 = vpack.c.bf16 %v2743_v39, %v2248_v38 }
 0x14e   : > { %2172 = vst [vmem:[%s2698_s7 + $0x38] sm:$0xff] %v2084_v40  }
 0x14f   : > { %823 = vst [vmem:[#allocation5 + $0x30] sm:$0xff] %v2692_v12  ;;  %824 = vst [vmem:[#allocation5] sm:$0xff] %v2694_v13 }
 0x150   : > { %825 = vst [vmem:[#allocation5 + $0x58] sm:$0xff] %v2701_v19  ;;  %826 = vst [vmem:[#allocation5 + $0x18] sm:$0xff] %v2703_v20 }
 0x151   : > { %827 = vst [vmem:[#allocation5 + $0x50] sm:$0xff] %v2708_v27  ;;  %828 = vst [vmem:[#allocation5 + $0x68] sm:$0xff] %v2710_v28 }
 0x152   : > { %829 = vst [vmem:[#allocation5 + $0x8] sm:$0xff] %v2715_v34  ;;  %830 = vst [vmem:[#allocation5 + $0x48] sm:$0xff] %v2717_v35 }
 0x153   : > { %831 = vst [vmem:[#allocation5 + $0x40] sm:$0xff] %v2722_v8  ;;  %832 = vst [vmem:[#allocation5 + $0x20] sm:$0xff] %v2724_v9 }
 0x154   : > { %833 = vst [vmem:[#allocation5 + $0x10] sm:$0xff] %v2729_v17  ;;  %834 = vst [vmem:[#allocation5 + $0x38] sm:$0xff] %v2731_v18 }
 0x155   : > { %835 = vst [vmem:[#allocation5 + $0x60] sm:$0xff] %v2736_v29  ;;  %836 = vst [vmem:[#allocation5 + $0x70] sm:$0xff] %v2738_v30 }
 0x156   : > { %837 = vst [vmem:[#allocation5 + $0x78] sm:$0xff] %v2248_v38  ;;  %838 = vst [vmem:[#allocation5 + $0x28] sm:$0xff] %v2743_v39 }
 0x157 PF: > { %p1940_p8 = scmp.le.s32.totalorder %s2402_s15, 0 }
 0x159   : > { %842 = sbr.rel (%p1940_p8) target bundleno = 361 (0x169), region = 48 }
 0x15e   : > { %v844_v10 = vld [vmem:[#allocation5 + $0x30] sm:$0xff]  ;;  %v845_v11 = vld [vmem:[#allocation5] sm:$0xff]  ;;  %v846_v14 = vld [vmem:[#allocation5 + $0x58] sm:$0xff] }
 0x15f   : > { %v860_v15 = vadd.f32 %v2692_v12, %v844_v10  ;;  %v861_v16 = vadd.f32 %v2694_v13, %v845_v11  ;;  %v862_v21 = vadd.f32 %v2701_v19, %v846_v14  ;;  %v847_v22 = vld [vmem:[#allocation5 + $0x18] sm:$0xff]  ;;  %v848_v23 = vld [vmem:[#allocation5 + $0x50] sm:$0xff]  ;;  %v849_v25 = vld [vmem:[#allocation5 + $0x68] sm:$0xff] }
 0x160   : > { %v863_v26 = vadd.f32 %v2703_v20, %v847_v22  ;;  %v864_v31 = vadd.f32 %v2708_v27, %v848_v23  ;;  %v865_v32 = vadd.f32 %v2710_v28, %v849_v25  ;;  %v850_v33 = vld [vmem:[#allocation5 + $0x8] sm:$0xff]  ;;  %v852_v37 = vld [vmem:[#allocation5 + $0x40] sm:$0xff]  ;;  %v854_v10 = vld [vmem:[#allocation5 + $0x10] sm:$0xff] }
 0x161   : > { %v851_v36 = vld [vmem:[#allocation5 + $0x48] sm:$0xff]  ;;  %876 = vst [vmem:[#allocation5 + $0x30] sm:$0xff] %v860_v15  ;;  %877 = vst [vmem:[#allocation5] sm:$0xff] %v861_v16  ;;  %v866_v12 = vadd.f32 %v2715_v34, %v850_v33  ;;  %v868_v19 = vadd.f32 %v2722_v8, %v852_v37  ;;  %v853_v40 = vld [vmem:[#allocation5 + $0x20] sm:$0xff]  ;;  %v870_v27 = vadd.f32 %v2729_v17, %v854_v10 }
 0x162   : > { %878 = vst [vmem:[#allocation5 + $0x58] sm:$0xff] %v862_v21  ;;  %v867_v13 = vadd.f32 %v2717_v35, %v851_v36  ;;  %v855_v11 = vld [vmem:[#allocation5 + $0x38] sm:$0xff]  ;;  %879 = vst [vmem:[#allocation5 + $0x18] sm:$0xff] %v863_v26  ;;  %v869_v20 = vadd.f32 %v2724_v9, %v853_v40  ;;  %v856_v14 = vld [vmem:[#allocation5 + $0x60] sm:$0xff] }
 0x163   : > { %880 = vst [vmem:[#allocation5 + $0x50] sm:$0xff] %v864_v31  ;;  %881 = vst [vmem:[#allocation5 + $0x68] sm:$0xff] %v865_v32  ;;  %v871_v28 = vadd.f32 %v2731_v18, %v855_v11  ;;  %v857_v15 = vld [vmem:[#allocation5 + $0x70] sm:$0xff]  ;;  %v858_v16 = vld [vmem:[#allocation5 + $0x78] sm:$0xff]  ;;  %v872_v34 = vadd.f32 %v2736_v29, %v856_v14 }
 0x164   : > { %882 = vst [vmem:[#allocation5 + $0x8] sm:$0xff] %v866_v12  ;;  %883 = vst [vmem:[#allocation5 + $0x48] sm:$0xff] %v867_v13  ;;  %v873_v35 = vadd.f32 %v2738_v30, %v857_v15  ;;  %v874_v8 = vadd.f32 %v2248_v38, %v858_v16  ;;  %v859_v21 = vld [vmem:[#allocation5 + $0x28] sm:$0xff] }
 0x165   : > { %884 = vst [vmem:[#allocation5 + $0x40] sm:$0xff] %v868_v19  ;;  %885 = vst [vmem:[#allocation5 + $0x20] sm:$0xff] %v869_v20  ;;  %v875_v9 = vadd.f32 %v2743_v39, %v859_v21 }
 0x166   : > { %886 = vst [vmem:[#allocation5 + $0x10] sm:$0xff] %v870_v27  ;;  %887 = vst [vmem:[#allocation5 + $0x38] sm:$0xff] %v871_v28 }
 0x167   : > { %888 = vst [vmem:[#allocation5 + $0x60] sm:$0xff] %v872_v34  ;;  %889 = vst [vmem:[#allocation5 + $0x70] sm:$0xff] %v873_v35 }
 0x168   : > { %890 = vst [vmem:[#allocation5 + $0x78] sm:$0xff] %v874_v8  ;;  %891 = vst [vmem:[#allocation5 + $0x28] sm:$0xff] %v875_v9 }
 0x169 PF: > { %892 = vxpose.xlu0.c.b16.start [1/8] %v2571_v41, 128  ;;  %908 = vxpose.xlu1.c.b16.start [1/8] %v2547_v24, 128  ;;  %v1948_v17 = vcombine.low %v2687_v6, %v2689_v7  ;;  %v1947_v18 = vcombine.low %v2683_v4, %v2685_v5  ;;  %v1946_v29 = vcombine.low %v2679_v2, %v2681_v3  ;;  %s2045_s8 = sshll.u32 %s3167_s23, 7 }
 0x16a   : > { %v1945_v24 = vcombine.low %v2675_v0, %v2677_v1  ;;  %v1944_v41 = vcombine.low %v2671_v62, %v2673_v63  ;;  %s2825_s9 = scalar_lea.vmem [#allocation3], %s2045_s8 }
 0x16b   : > { %2276 = vmatprep.subr.bf16.mxu1 %v1948_v17 }
 0x16c   : > { %2277 = vmatpush3.bf16.msra.mxu1 %v1948_v17 }
 0x16d   : > { %893 = vxpose.xlu0.c.b16.cont [2/8] %v2583_v43, 128  ;;  %909 = vxpose.xlu1.c.b16.cont [2/8] %v2576_v42, 128  ;;  %v1943_v42 = vcombine.low %v2667_v60, %v2669_v61  ;;  %v1942_v43 = vcombine.low %v2663_v58, %v2665_v59 }
 0x16e   : > { %2278 = vmatprep.subr.bf16.mxu1 %v1947_v18 }
 0x170   : > { %2279 = vmatpush3.bf16.msra.mxu1 %v1947_v18 }
 0x171   : > { %894 = vxpose.xlu0.c.b16.cont [3/8] %v2595_v45, 128  ;;  %910 = vxpose.xlu1.c.b16.cont [3/8] %v2588_v44, 128  ;;  %v1941_v44 = vcombine.low %v2659_v56, %v2661_v57 }
 0x172   : > { %2280 = vmatprep.subr.bf16.mxu1 %v1946_v29 }
 0x174   : > { %2281 = vmatpush3.bf16.msra.mxu1 %v1946_v29 }
 0x175   : > { %895 = vxpose.xlu0.c.b16.cont [4/8] %v2607_v47, 128  ;;  %911 = vxpose.xlu1.c.b16.cont [4/8] %v2600_v46, 128 }
 0x176   : > { %2282 = vmatprep.subr.bf16.mxu1 %v1945_v24 }
 0x178   : > { %2283 = vmatpush3.bf16.msra.mxu1 %v1945_v24 }
 0x179   : > { %896 = vxpose.xlu0.c.b16.cont [5/8] %v2619_v49, 128  ;;  %912 = vxpose.xlu1.c.b16.cont [5/8] %v2612_v48, 128 }
 0x17a   : > { %2284 = vmatprep.subr.bf16.mxu1 %v1944_v41 }
 0x17c   : > { %2285 = vmatpush3.bf16.msra.mxu1 %v1944_v41 }
 0x17d   : > { %897 = vxpose.xlu0.c.b16.cont [6/8] %v2631_v51, 128  ;;  %913 = vxpose.xlu1.c.b16.cont [6/8] %v2624_v50, 128 }
 0x17e   : > { %2286 = vmatprep.subr.bf16.mxu1 %v1943_v42 }
 0x180   : > { %2287 = vmatpush3.bf16.msra.mxu1 %v1943_v42 }
 0x181   : > { %898 = vxpose.xlu0.c.b16.cont [7/8] %v2643_v53, 128  ;;  %914 = vxpose.xlu1.c.b16.cont [7/8] %v2636_v52, 128 }
 0x182   : > { %2288 = vmatprep.subr.bf16.mxu1 %v1942_v43 }
 0x184   : > { %2289 = vmatpush3.bf16.msra.mxu1 %v1942_v43 }
 0x185   : > { %899 = vxpose.xlu0.c.b16.end [8/8] %v2655_v55, 128  ;;  %915 = vxpose.xlu1.c.b16.end [8/8] %v2648_v54, 128 }
 0x186   : > { %2290 = vmatprep.subr.bf16.mxu1 %v1941_v44 }
 0x188   : > { %2291 = vmatpush3.bf16.msra.mxu1 %v1941_v44 }
 0x1cb   : > { %v900_v45 = vpop.trf.xlu0  ;;  %v916_v49 = vpop.trf.xlu1 }
 0x1cc   : > { %2292 = vmatprep.mubr.bf16.mxu1 %v900_v45 }
 0x1cf   : > { %v901_v46 = vpop.trf.xlu0  ;;  %v917_v52 = vpop.trf.xlu1 }
 0x1d0   : > { %2293 = vmatmul.mubr.bf16.vlgmr.msra.gmra.mxu1 %v901_v46 }
 0x1d3   : > { %v902_v47 = vpop.trf.xlu0  ;;  %v918_v55 = vpop.trf.xlu1 }
 0x1d4   : > { %2296 = vmatprep.mubr.bf16.mxu1 %v902_v47 }
 0x1d7   : > { %v903_v48 = vpop.trf.xlu0  ;;  %v919_v56 = vpop.trf.xlu1 }
 0x1d8   : > { %2297 = vmatmul.mubr.bf16.gmra.mxu1 %v903_v48 }
 0x1db   : > { %v904_v50 = vpop.trf.xlu0  ;;  %v920_v57 = vpop.trf.xlu1 }
 0x1dc   : > { %2300 = vmatprep.mubr.bf16.mxu1 %v904_v50 }
 0x1df   : > { %v905_v51 = vpop.trf.xlu0  ;;  %v921_v58 = vpop.trf.xlu1 }
 0x1e0   : > { %2301 = vmatmul.mubr.bf16.gmra.mxu1 %v905_v51 }
 0x1e3   : > { %v906_v53 = vpop.trf.xlu0  ;;  %v922_v59 = vpop.trf.xlu1 }
 0x1e4   : > { %2304 = vmatprep.mubr.bf16.mxu1 %v906_v53 }
 0x1e7   : > { %v907_v54 = vpop.trf.xlu0  ;;  %v923_v60 = vpop.trf.xlu1 }
 0x1e8   : > { %2305 = vmatmul.mubr.bf16.gmra.mxu1 %v907_v54 }
 0x1e9   : > { %2308 = vmatprep.mubr.bf16.mxu1 %v916_v49 }
 0x1f0   : > { %2309 = vmatmul.mubr.bf16.gmra.mxu1 %v917_v52 }
 0x1f1   : > { %2312 = vmatprep.mubr.bf16.mxu1 %v918_v55 }
 0x1f8   : > { %2313 = vmatmul.mubr.bf16.gmra.mxu1 %v919_v56 }
 0x1f9   : > { %2316 = vmatprep.mubr.bf16.mxu1 %v920_v57 }
 0x200   : > { %2317 = vmatmul.mubr.bf16.gmra.mxu1 %v921_v58 }
 0x201   : > { %2320 = vmatprep.mubr.bf16.mxu1 %v922_v59 }
 0x208   : > { %2321 = vmatmul.mubr.bf16.gmra.mxu1 %v923_v60 }
 0x290   : > { %v2814_v61 = vpop.f32.mrf.mxu1 }
 0x292   : > { %v2817_v62 = vpop.f32.mrf.mxu1 }
 0x294   : > { %v2819_v63 = vpop.f32.mrf.mxu1 }
 0x295   : > { %v2094_v0 = vpack.c.bf16 %v2819_v63, %v2814_v61 }
 0x296   : > { %v2823_v1 = vpop.f32.mrf.mxu1 }
 0x297   : > { %2173 = vst [vmem:[%s2825_s9 + $0x8] sm:$0xff] %v2094_v0   ;;  %v2089_v2 = vpack.c.bf16 %v2823_v1, %v2817_v62 }
 0x298   : > { %v2830_v3 = vpop.f32.mrf.mxu1 }
 0x299   : > { %2090 = vst [vmem:[%s2825_s9] sm:$0xff] %v2089_v2  }
 0x29a   : > { %v2833_v4 = vpop.f32.mrf.mxu1 }
 0x29c   : > { %v2835_v5 = vpop.f32.mrf.mxu1 }
 0x29d   : > { %v2104_v6 = vpack.c.bf16 %v2835_v5, %v2830_v3 }
 0x29e   : > { %v2839_v7 = vpop.f32.mrf.mxu1 }
 0x29f   : > { %2175 = vst [vmem:[%s2825_s9 + $0x18] sm:$0xff] %v2104_v6   ;;  %v2099_v30 = vpack.c.bf16 %v2839_v7, %v2833_v4 }
 0x2a0   : > { %v2844_v38 = vpop.f32.mrf.mxu1 }
 0x2a1   : > { %2174 = vst [vmem:[%s2825_s9 + $0x10] sm:$0xff] %v2099_v30  }
 0x2a2   : > { %v2847_v39 = vpop.f32.mrf.mxu1 }
 0x2a4   : > { %v2849_v22 = vpop.f32.mrf.mxu1 }
 0x2a5   : > { %v2114_v23 = vpack.c.bf16 %v2849_v22, %v2844_v38 }
 0x2a6   : > { %v2853_v25 = vpop.f32.mrf.mxu1 }
 0x2a7   : > { %2177 = vst [vmem:[%s2825_s9 + $0x28] sm:$0xff] %v2114_v23   ;;  %v2109_v26 = vpack.c.bf16 %v2853_v25, %v2847_v39 }
 0x2a8   : > { %v2858_v31 = vpop.f32.mrf.mxu1 }
 0x2a9   : > { %2176 = vst [vmem:[%s2825_s9 + $0x20] sm:$0xff] %v2109_v26  }
 0x2aa   : > { %v2861_v32 = vpop.f32.mrf.mxu1 }
 0x2ac   : > { %v2863_v33 = vpop.f32.mrf.mxu1 }
 0x2ad   : > { %v2124_v36 = vpack.c.bf16 %v2863_v33, %v2858_v31 }
 0x2ae   : > { %v2867_v37 = vpop.f32.mrf.mxu1 }
 0x2af   : > { %2179 = vst [vmem:[%s2825_s9 + $0x38] sm:$0xff] %v2124_v36   ;;  %v2119_v12 = vpack.c.bf16 %v2867_v37, %v2861_v32 }
 0x2b0   : > { %v2872_v13 = vpop.f32.mrf.mxu1 }
 0x2b1   : > { %2178 = vst [vmem:[%s2825_s9 + $0x30] sm:$0xff] %v2119_v12  }
 0x2b2   : > { %v2875_v19 = vpop.f32.mrf.mxu1 }
 0x2b4   : > { %v2877_v40 = vpop.f32.mrf.mxu1 }
 0x2b5   : > { %v2134_v10 = vpack.c.bf16 %v2877_v40, %v2872_v13 }
 0x2b6   : > { %v2881_v11 = vpop.f32.mrf.mxu1 }
 0x2b7   : > { %2181 = vst [vmem:[%s2825_s9 + $0x48] sm:$0xff] %v2134_v10   ;;  %v2129_v20 = vpack.c.bf16 %v2881_v11, %v2875_v19 }
 0x2b8   : > { %v2886_v27 = vpop.f32.mrf.mxu1 }
 0x2b9   : > { %2180 = vst [vmem:[%s2825_s9 + $0x40] sm:$0xff] %v2129_v20  }
 0x2ba   : > { %v2889_v28 = vpop.f32.mrf.mxu1 }
 0x2bc   : > { %v2891_v14 = vpop.f32.mrf.mxu1 }
 0x2bd   : > { %v2144_v15 = vpack.c.bf16 %v2891_v14, %v2886_v27 }
 0x2be   : > { %v2895_v16 = vpop.f32.mrf.mxu1 }
 0x2bf   : > { %2183 = vst [vmem:[%s2825_s9 + $0x58] sm:$0xff] %v2144_v15   ;;  %v2139_v34 = vpack.c.bf16 %v2895_v16, %v2889_v28 }
 0x2c0   : > { %v2900_v35 = vpop.f32.mrf.mxu1 }
 0x2c1   : > { %2182 = vst [vmem:[%s2825_s9 + $0x50] sm:$0xff] %v2139_v34  }
 0x2c2   : > { %v2903_v8 = vpop.f32.mrf.mxu1 }
 0x2c4   : > { %v2905_v21 = vpop.f32.mrf.mxu1 }
 0x2c5   : > { %v2154_v9 = vpack.c.bf16 %v2905_v21, %v2900_v35 }
 0x2c6   : > { %v2909_v17 = vpop.f32.mrf.mxu1 }
 0x2c7   : > { %2185 = vst [vmem:[%s2825_s9 + $0x68] sm:$0xff] %v2154_v9   ;;  %v2149_v18 = vpack.c.bf16 %v2909_v17, %v2903_v8 }
 0x2c8   : > { %v2914_v29 = vpop.f32.mrf.mxu1 }
 0x2c9   : > { %2184 = vst [vmem:[%s2825_s9 + $0x60] sm:$0xff] %v2149_v18  }
 0x2ca   : > { %v2917_v24 = vpop.f32.mrf.mxu1 }
 0x2cc   : > { %v2919_v41 = vpop.f32.mrf.mxu1 }
 0x2cd   : > { %v2164_v42 = vpack.c.bf16 %v2919_v41, %v2914_v29  ;;  %1468 = sbr.rel (%p1882_p7) target bundleno = 738 (0x2e2), region = 64 }
 0x2ce   : > { %v2923_v43 = vpop.f32.mrf.mxu1 }
 0x2cf   : > { %2187 = vst [vmem:[%s2825_s9 + $0x78] sm:$0xff] %v2164_v42   ;;  %v2159_v44 = vpack.c.bf16 %v2923_v43, %v2917_v24 }
 0x2d1   : > { %2186 = vst [vmem:[%s2825_s9 + $0x70] sm:$0xff] %v2159_v44  }
 0x2d2   : > { %1469 = vst [vmem:[#allocation6 + $0xa8] sm:$0xff] %v2817_v62  ;;  %1470 = vst [vmem:[#allocation6 + $0x68] sm:$0xff] %v2823_v1 }
 0x2d3   : > { %1471 = vst [vmem:[#allocation6 + $0x10] sm:$0xff] %v2814_v61  ;;  %1472 = vst [vmem:[#allocation6 + $0xc0] sm:$0xff] %v2819_v63 }
 0x2d4   : > { %1473 = vst [vmem:[#allocation6 + $0xc8] sm:$0xff] %v2833_v4  ;;  %1474 = vst [vmem:[#allocation6 + $0xb0] sm:$0xff] %v2839_v7 }
 0x2d5   : > { %1475 = vst [vmem:[#allocation6 + $0x70] sm:$0xff] %v2830_v3  ;;  %1476 = vst [vmem:[#allocation6 + $0x38] sm:$0xff] %v2835_v5 }
 0x2d6   : > { %1477 = vst [vmem:[#allocation6 + $0x48] sm:$0xff] %v2847_v39  ;;  %1478 = vst [vmem:[#allocation6 + $0xf8] sm:$0xff] %v2853_v25 }
 0x2d7   : > { %1479 = vst [vmem:[#allocation6 + $0x78] sm:$0xff] %v2844_v38  ;;  %1480 = vst [vmem:[#allocation6 + $0x88] sm:$0xff] %v2849_v22 }
 0x2d8   : > { %1481 = vst [vmem:[#allocation6 + $0xf0] sm:$0xff] %v2861_v32  ;;  %1482 = vst [vmem:[#allocation6 + $0x18] sm:$0xff] %v2867_v37 }
 0x2d9   : > { %1483 = vst [vmem:[#allocation6 + $0x30] sm:$0xff] %v2858_v31  ;;  %1484 = vst [vmem:[#allocation6 + $0x50] sm:$0xff] %v2863_v33 }
 0x2da   : > { %1485 = vst [vmem:[#allocation6 + $0xb8] sm:$0xff] %v2875_v19  ;;  %1486 = vst [vmem:[#allocation6 + $0xd0] sm:$0xff] %v2881_v11 }
 0x2db   : > { %1487 = vst [vmem:[#allocation6 + $0xd8] sm:$0xff] %v2872_v13  ;;  %1488 = vst [vmem:[#allocation6 + $0x58] sm:$0xff] %v2877_v40 }
 0x2dc   : > { %1489 = vst [vmem:[#allocation6 + $0x80] sm:$0xff] %v2889_v28  ;;  %1490 = vst [vmem:[#allocation6 + $0x40] sm:$0xff] %v2895_v16 }
 0x2dd   : > { %1491 = vst [vmem:[#allocation6 + $0x28] sm:$0xff] %v2886_v27  ;;  %1492 = vst [vmem:[#allocation6] sm:$0xff] %v2891_v14 }
 0x2de   : > { %1493 = vst [vmem:[#allocation6 + $0x90] sm:$0xff] %v2903_v8  ;;  %1494 = vst [vmem:[#allocation6 + $0xe8] sm:$0xff] %v2909_v17 }
 0x2df   : > { %1495 = vst [vmem:[#allocation6 + $0xa0] sm:$0xff] %v2900_v35  ;;  %1496 = vst [vmem:[#allocation6 + $0x20] sm:$0xff] %v2905_v21 }
 0x2e0   : > { %1497 = vst [vmem:[#allocation6 + $0x8] sm:$0xff] %v2917_v24  ;;  %1498 = vst [vmem:[#allocation6 + $0xe0] sm:$0xff] %v2923_v43 }
 0x2e1   : > { %1499 = vst [vmem:[#allocation6 + $0x60] sm:$0xff] %v2914_v29  ;;  %1500 = vst [vmem:[#allocation6 + $0x98] sm:$0xff] %v2919_v41 }
 0x2e2 PF: > { %1503 = sbr.rel (%p1940_p8) target bundleno = 762 (0x2fa), region = 68 }
 0x2e7   : > { %v1506_v47 = vld [vmem:[#allocation6 + $0x10] sm:$0xff]  ;;  %v1507_v51 = vld [vmem:[#allocation6 + $0xc0] sm:$0xff]  ;;  %v1508_v52 = vld [vmem:[#allocation6 + $0xc8] sm:$0xff] }
 0x2e8   : > { %v1538_v50 = vadd.f32 %v2814_v61, %v1506_v47  ;;  %v1509_v53 = vld [vmem:[#allocation6 + $0xb0] sm:$0xff]  ;;  %v1539_v55 = vadd.f32 %v2819_v63, %v1507_v51  ;;  %v1540_v54 = vadd.f32 %v1508_v52, %v2833_v4  ;;  %v1511_v58 = vld [vmem:[#allocation6 + $0x38] sm:$0xff]  ;;  %v1512_v59 = vld [vmem:[#allocation6 + $0x48] sm:$0xff] }
 0x2e9   : > { %v1504_v45 = vld [vmem:[#allocation6 + $0xa8] sm:$0xff]  ;;  %v1541_v56 = vadd.f32 %v1509_v53, %v2839_v7  ;;  %v1510_v57 = vld [vmem:[#allocation6 + $0x70] sm:$0xff]  ;;  %v1544_v61 = vadd.f32 %v1512_v59, %v2847_v39  ;;  %v1513_v0 = vld [vmem:[#allocation6 + $0xf8] sm:$0xff] }
 0x2ea   : > { %v1505_v46 = vld [vmem:[#allocation6 + $0x68] sm:$0xff]  ;;  %v1536_v48 = vadd.f32 %v1504_v45, %v2817_v62  ;;  %1570 = vst [vmem:[#allocation6 + $0x10] sm:$0xff] %v1538_v50  ;;  %v1542_v60 = vadd.f32 %v2830_v3, %v1510_v57  ;;  %v1543_v62 = vadd.f32 %v2835_v5, %v1511_v58  ;;  %1571 = vst [vmem:[#allocation6 + $0xc0] sm:$0xff] %v1539_v55  ;;  %v1516_v7 = vld [vmem:[#allocation6 + $0xf0] sm:$0xff] }
 0x2eb   : > { %v1537_v49 = vadd.f32 %v1505_v46, %v2823_v1  ;;  %v1514_v1 = vld [vmem:[#allocation6 + $0x78] sm:$0xff]  ;;  %v1515_v2 = vld [vmem:[#allocation6 + $0x88] sm:$0xff]  ;;  %1572 = vst [vmem:[#allocation6 + $0xc8] sm:$0xff] %v1540_v54  ;;  %1573 = vst [vmem:[#allocation6 + $0xb0] sm:$0xff] %v1541_v56  ;;  %v1545_v63 = vadd.f32 %v1513_v0, %v2853_v25  ;;  %v1548_v3 = vadd.f32 %v1516_v7, %v2861_v32 }
 0x2ec   : > { %1568 = vst [vmem:[#allocation6 + $0xa8] sm:$0xff] %v1536_v48  ;;  %v1546_v4 = vadd.f32 %v2844_v38, %v1514_v1  ;;  %v1547_v6 = vadd.f32 %v2849_v22, %v1515_v2  ;;  %v1517_v30 = vld [vmem:[#allocation6 + $0x18] sm:$0xff]  ;;  %v1518_v23 = vld [vmem:[#allocation6 + $0x30] sm:$0xff]  ;;  %1574 = vst [vmem:[#allocation6 + $0x70] sm:$0xff] %v1542_v60 }
 0x2ed   : > { %1569 = vst [vmem:[#allocation6 + $0x68] sm:$0xff] %v1537_v49  ;;  %1575 = vst [vmem:[#allocation6 + $0x38] sm:$0xff] %v1543_v62  ;;  %v1549_v5 = vadd.f32 %v1517_v30, %v2867_v37  ;;  %v1550_v39 = vadd.f32 %v2858_v31, %v1518_v23  ;;  %v1519_v26 = vld [vmem:[#allocation6 + $0x50] sm:$0xff]  ;;  %v1520_v36 = vld [vmem:[#allocation6 + $0xb8] sm:$0xff] }
 0x2ee   : > { %1576 = vst [vmem:[#allocation6 + $0x48] sm:$0xff] %v1544_v61  ;;  %v1521_v12 = vld [vmem:[#allocation6 + $0xd0] sm:$0xff]  ;;  %1577 = vst [vmem:[#allocation6 + $0xf8] sm:$0xff] %v1545_v63  ;;  %v1551_v38 = vadd.f32 %v2863_v33, %v1519_v26  ;;  %v1552_v22 = vadd.f32 %v1520_v36, %v2875_v19  ;;  %v1522_v10 = vld [vmem:[#allocation6 + $0xd8] sm:$0xff] }
 0x2ef   : > { %1578 = vst [vmem:[#allocation6 + $0x78] sm:$0xff] %v1546_v4  ;;  %1579 = vst [vmem:[#allocation6 + $0x88] sm:$0xff] %v1547_v6  ;;  %v1553_v25 = vadd.f32 %v1521_v12, %v2881_v11  ;;  %v1523_v20 = vld [vmem:[#allocation6 + $0x58] sm:$0xff]  ;;  %v1524_v15 = vld [vmem:[#allocation6 + $0x80] sm:$0xff]  ;;  %v1554_v31 = vadd.f32 %v2872_v13, %v1522_v10 }
 0x2f0   : > { %1580 = vst [vmem:[#allocation6 + $0xf0] sm:$0xff] %v1548_v3  ;;  %1581 = vst [vmem:[#allocation6 + $0x18] sm:$0xff] %v1549_v5  ;;  %v1555_v32 = vadd.f32 %v2877_v40, %v1523_v20  ;;  %v1556_v37 = vadd.f32 %v1524_v15, %v2889_v28  ;;  %v1525_v34 = vld [vmem:[#allocation6 + $0x40] sm:$0xff]  ;;  %v1526_v9 = vld [vmem:[#allocation6 + $0x28] sm:$0xff] }
 0x2f1   : > { %1582 = vst [vmem:[#allocation6 + $0x30] sm:$0xff] %v1550_v39  ;;  %v1527_v18 = vld [vmem:[#allocation6] sm:$0xff]  ;;  %1583 = vst [vmem:[#allocation6 + $0x50] sm:$0xff] %v1551_v38  ;;  %v1557_v33 = vadd.f32 %v1525_v34, %v2895_v16  ;;  %v1558_v19 = vadd.f32 %v2886_v27, %v1526_v9  ;;  %v1528_v42 = vld [vmem:[#allocation6 + $0x90] sm:$0xff] }
 0x2f2   : > { %1584 = vst [vmem:[#allocation6 + $0xb8] sm:$0xff] %v1552_v22  ;;  %1585 = vst [vmem:[#allocation6 + $0xd0] sm:$0xff] %v1553_v25  ;;  %v1559_v11 = vadd.f32 %v2891_v14, %v1527_v18  ;;  %v1529_v44 = vld [vmem:[#allocation6 + $0xe8] sm:$0xff]  ;;  %v1530_v45 = vld [vmem:[#allocation6 + $0xa0] sm:$0xff]  ;;  %v1560_v13 = vadd.f32 %v1528_v42, %v2903_v8 }
 0x2f3   : > { %1586 = vst [vmem:[#allocation6 + $0xd8] sm:$0xff] %v1554_v31  ;;  %1587 = vst [vmem:[#allocation6 + $0x58] sm:$0xff] %v1555_v32  ;;  %v1561_v40 = vadd.f32 %v1529_v44, %v2909_v17  ;;  %v1562_v28 = vadd.f32 %v2900_v35, %v1530_v45  ;;  %v1531_v46 = vld [vmem:[#allocation6 + $0x20] sm:$0xff]  ;;  %v1532_v47 = vld [vmem:[#allocation6 + $0x8] sm:$0xff] }
 0x2f4   : > { %1588 = vst [vmem:[#allocation6 + $0x80] sm:$0xff] %v1556_v37  ;;  %v1533_v48 = vld [vmem:[#allocation6 + $0xe0] sm:$0xff]  ;;  %1589 = vst [vmem:[#allocation6 + $0x40] sm:$0xff] %v1557_v33  ;;  %v1563_v27 = vadd.f32 %v2905_v21, %v1531_v46  ;;  %v1564_v14 = vadd.f32 %v1532_v47, %v2917_v24  ;;  %v1535_v50 = vld [vmem:[#allocation6 + $0x98] sm:$0xff] }
 0x2f5   : > { %1590 = vst [vmem:[#allocation6 + $0x28] sm:$0xff] %v1558_v19  ;;  %1591 = vst [vmem:[#allocation6] sm:$0xff] %v1559_v11  ;;  %v1565_v16 = vadd.f32 %v1533_v48, %v2923_v43  ;;  %v1534_v49 = vld [vmem:[#allocation6 + $0x60] sm:$0xff]  ;;  %v1567_v35 = vadd.f32 %v2919_v41, %v1535_v50 }
 0x2f6   : > { %1592 = vst [vmem:[#allocation6 + $0x90] sm:$0xff] %v1560_v13  ;;  %1593 = vst [vmem:[#allocation6 + $0xe8] sm:$0xff] %v1561_v40  ;;  %v1566_v8 = vadd.f32 %v2914_v29, %v1534_v49 }
 0x2f7   : > { %1594 = vst [vmem:[#allocation6 + $0xa0] sm:$0xff] %v1562_v28  ;;  %1595 = vst [vmem:[#allocation6 + $0x20] sm:$0xff] %v1563_v27 }
 0x2f8   : > { %1596 = vst [vmem:[#allocation6 + $0x8] sm:$0xff] %v1564_v14  ;;  %1597 = vst [vmem:[#allocation6 + $0xe0] sm:$0xff] %v1565_v16 }
 0x2f9   : > { %1598 = vst [vmem:[#allocation6 + $0x60] sm:$0xff] %v1566_v8  ;;  %1599 = vst [vmem:[#allocation6 + $0x98] sm:$0xff] %v1567_v35 }
 0x2fa PF: > { %p1985_p9 = scmp.ne.s32.totalorder %s2402_s15, 2 }
 0x2fc   : > { %1603 = sbr.rel (%p1985_p9) target bundleno = 793 (0x319), region = 72 }
 0x301   : > { %v1604_v21 = vld [vmem:[#allocation6 + $0xa8] sm:$0xff]  ;;  %v1606_v24 = vld [vmem:[#allocation6 + $0x10] sm:$0xff]  ;;  %v1607_v29 = vld [vmem:[#allocation6 + $0xc0] sm:$0xff] }
 0x302   : > { %v1605_v17 = vld [vmem:[#allocation6 + $0x68] sm:$0xff]  ;;  %v1636_v43 = vmul.f32 0.33333334, %v1604_v21  ;;  %v1638_v52 = vmul.f32 0.33333334, %v1606_v24  ;;  %v1609_v41 = vld [vmem:[#allocation6 + $0xb0] sm:$0xff] }
 0x303   : > { %v1637_v51 = vmul.f32 0.33333334, %v1605_v17  ;;  %v1608_v53 = vld [vmem:[#allocation6 + $0xc8] sm:$0xff]  ;;  %v1639_v55 = vmul.f32 0.33333334, %v1607_v29  ;;  %v1610_v57 = vld [vmem:[#allocation6 + $0x70] sm:$0xff] }
 0x304   : > { %1668 = vst [vmem:[%s3159_s4] sm:$0xff] %v1636_v43  ;;  %1670 = vst [vmem:[%s3159_s4 + $0x10] sm:$0xff] %v1638_v52  ;;  %v1640_v54 = vmul.f32 0.33333334, %v1608_v53  ;;  %v1641_v56 = vmul.f32 0.33333334, %v1609_v41  ;;  %v1611_v58 = vld [vmem:[#allocation6 + $0x38] sm:$0xff] }
 0x305   : > { %1669 = vst [vmem:[%s3159_s4 + $0x8] sm:$0xff] %v1637_v51  ;;  %v1612_v59 = vld [vmem:[#allocation6 + $0x48] sm:$0xff]  ;;  %1671 = vst [vmem:[%s3159_s4 + $0x18] sm:$0xff] %v1639_v55  ;;  %v1642_v60 = vmul.f32 0.33333334, %v1610_v57  ;;  %v1613_v0 = vld [vmem:[#allocation6 + $0xf8] sm:$0xff] }
 0x306   : > { %1672 = vst [vmem:[%s3159_s4 + $0x20] sm:$0xff] %v1640_v54  ;;  %1673 = vst [vmem:[%s3159_s4 + $0x28] sm:$0xff] %v1641_v56  ;;  %v1643_v62 = vmul.f32 0.33333334, %v1611_v58  ;;  %v1644_v61 = vmul.f32 0.33333334, %v1612_v59 }
 0x307   : > { %v1614_v1 = vld [vmem:[#allocation6 + $0x78] sm:$0xff]  ;;  %v1615_v2 = vld [vmem:[#allocation6 + $0x88] sm:$0xff]  ;;  %1674 = vst [vmem:[%s3159_s4 + $0x30] sm:$0xff] %v1642_v60  ;;  %v1645_v63 = vmul.f32 0.33333334, %v1613_v0  ;;  %v1616_v7 = vld [vmem:[#allocation6 + $0xf0] sm:$0xff] }
 0x308   : > { %1675 = vst [vmem:[%s3159_s4 + $0x38] sm:$0xff] %v1643_v62  ;;  %1676 = vst [vmem:[%s3159_s4 + $0x40] sm:$0xff] %v1644_v61  ;;  %v1646_v4 = vmul.f32 0.33333334, %v1614_v1  ;;  %v1647_v6 = vmul.f32 0.33333334, %v1615_v2 }
 0x309   : > { %v1617_v30 = vld [vmem:[#allocation6 + $0x18] sm:$0xff]  ;;  %v1618_v23 = vld [vmem:[#allocation6 + $0x30] sm:$0xff]  ;;  %1677 = vst [vmem:[%s3159_s4 + $0x48] sm:$0xff] %v1645_v63  ;;  %v1648_v3 = vmul.f32 0.33333334, %v1616_v7  ;;  %v1624_v15 = vld [vmem:[#allocation6 + $0x80] sm:$0xff] }
 0x30a   : > { %1678 = vst [vmem:[%s3159_s4 + $0x50] sm:$0xff] %v1646_v4  ;;  %1679 = vst [vmem:[%s3159_s4 + $0x58] sm:$0xff] %v1647_v6  ;;  %v1649_v5 = vmul.f32 0.33333334, %v1617_v30  ;;  %v1650_v39 = vmul.f32 0.33333334, %v1618_v23 }
 0x30b   : > { %v1619_v26 = vld [vmem:[#allocation6 + $0x50] sm:$0xff]  ;;  %v1620_v36 = vld [vmem:[#allocation6 + $0xb8] sm:$0xff]  ;;  %1680 = vst [vmem:[%s3159_s4 + $0x60] sm:$0xff] %v1648_v3  ;;  %v1656_v37 = vmul.f32 0.33333334, %v1624_v15  ;;  %v1625_v34 = vld [vmem:[#allocation6 + $0x40] sm:$0xff] }
 0x30c   : > { %v1621_v12 = vld [vmem:[#allocation6 + $0xd0] sm:$0xff]  ;;  %1681 = vst [vmem:[%s3159_s4 + $0x68] sm:$0xff] %v1649_v5  ;;  %1682 = vst [vmem:[%s3159_s4 + $0x70] sm:$0xff] %v1650_v39  ;;  %v1651_v38 = vmul.f32 0.33333334, %v1619_v26  ;;  %v1622_v10 = vld [vmem:[#allocation6 + $0xd8] sm:$0xff] }
 0x30d   : > { %v1652_v22 = vmul.f32 0.33333334, %v1620_v36  ;;  %v1653_v25 = vmul.f32 0.33333334, %v1621_v12  ;;  %v1623_v20 = vld [vmem:[#allocation6 + $0x58] sm:$0xff]  ;;  %v1626_v9 = vld [vmem:[#allocation6 + $0x28] sm:$0xff] }
 0x30e   : > { %1683 = vst [vmem:[%s3159_s4 + $0x78] sm:$0xff] %v1651_v38  ;;  %v1654_v31 = vmul.f32 0.33333334, %v1622_v10  ;;  %v1655_v32 = vmul.f32 0.33333334, %v1623_v20  ;;  %v1627_v18 = vld [vmem:[#allocation6] sm:$0xff] }
 0x30f   : > { %1684 = vst [vmem:[%s3159_s4 + $0x80] sm:$0xff] %v1652_v22  ;;  %1685 = vst [vmem:[%s3159_s4 + $0x88] sm:$0xff] %v1653_v25  ;;  %v1657_v33 = vmul.f32 0.33333334, %v1625_v34  ;;  %v1658_v19 = vmul.f32 0.33333334, %v1626_v9 }
 0x310   : > { %1686 = vst [vmem:[%s3159_s4 + $0x90] sm:$0xff] %v1654_v31  ;;  %1687 = vst [vmem:[%s3159_s4 + $0x98] sm:$0xff] %v1655_v32  ;;  %v1659_v11 = vmul.f32 0.33333334, %v1627_v18  ;;  %v1628_v42 = vld [vmem:[#allocation6 + $0x90] sm:$0xff]  ;;  %v1629_v44 = vld [vmem:[#allocation6 + $0xe8] sm:$0xff] }
 0x311   : > { %1688 = vst [vmem:[%s3159_s4 + $0xa0] sm:$0xff] %v1656_v37  ;;  %v1630_v45 = vld [vmem:[#allocation6 + $0xa0] sm:$0xff]  ;;  %1689 = vst [vmem:[%s3159_s4 + $0xa8] sm:$0xff] %v1657_v33  ;;  %v1660_v13 = vmul.f32 0.33333334, %v1628_v42  ;;  %v1632_v47 = vld [vmem:[#allocation6 + $0x8] sm:$0xff] }
 0x312   : > { %1690 = vst [vmem:[%s3159_s4 + $0xb0] sm:$0xff] %v1658_v19  ;;  %1691 = vst [vmem:[%s3159_s4 + $0xb8] sm:$0xff] %v1659_v11  ;;  %v1661_v40 = vmul.f32 0.33333334, %v1629_v44  ;;  %v1662_v28 = vmul.f32 0.33333334, %v1630_v45 }
 0x313   : > { %v1631_v46 = vld [vmem:[#allocation6 + $0x20] sm:$0xff]  ;;  %1692 = vst [vmem:[%s3159_s4 + $0xc0] sm:$0xff] %v1660_v13  ;;  %v1664_v14 = vmul.f32 0.33333334, %v1632_v47  ;;  %v1635_v50 = vld [vmem:[#allocation6 + $0x98] sm:$0xff] }
 0x314   : > { %v1633_v48 = vld [vmem:[#allocation6 + $0xe0] sm:$0xff]  ;;  %1693 = vst [vmem:[%s3159_s4 + $0xc8] sm:$0xff] %v1661_v40  ;;  %1694 = vst [vmem:[%s3159_s4 + $0xd0] sm:$0xff] %v1662_v28  ;;  %v1663_v27 = vmul.f32 0.33333334, %v1631_v46 }
 0x315   : > { %v1665_v16 = vmul.f32 0.33333334, %v1633_v48  ;;  %v1634_v49 = vld [vmem:[#allocation6 + $0x60] sm:$0xff]  ;;  %1696 = vst [vmem:[%s3159_s4 + $0xe0] sm:$0xff] %v1664_v14  ;;  %v1667_v35 = vmul.f32 0.33333334, %v1635_v50 }
 0x316   : > { %1695 = vst [vmem:[%s3159_s4 + $0xd8] sm:$0xff] %v1663_v27  ;;  %v1666_v8 = vmul.f32 0.33333334, %v1634_v49 }
 0x317   : > { %1697 = vst [vmem:[%s3159_s4 + $0xe8] sm:$0xff] %v1665_v16  ;;  %1699 = vst [vmem:[%s3159_s4 + $0xf8] sm:$0xff] %v1667_v35 }
 0x318   : > { %1698 = vst [vmem:[%s3159_s4 + $0xf0] sm:$0xff] %v1666_v8 }
 0x319 PF: > { %1703 = sbr.rel (%p1985_p9) target bundleno = 811 (0x32b), region = 76 }
 0x31e   : > { %v1705_v21 = vld [vmem:[#allocation5 + $0x30] sm:$0xff]  ;;  %v1706_v17 = vld [vmem:[#allocation5] sm:$0xff]  ;;  %v1707_v24 = vld [vmem:[#allocation5 + $0x58] sm:$0xff] }
 0x31f   : > { %v1721_v43 = vmul.f32 0.33333334, %v1705_v21  ;;  %v1722_v51 = vmul.f32 0.33333334, %v1706_v17  ;;  %v1723_v52 = vmul.f32 0.33333334, %v1707_v24 }
 0x320   : > { %v1708_v29 = vld [vmem:[#allocation5 + $0x18] sm:$0xff]  ;;  %v1709_v53 = vld [vmem:[#allocation5 + $0x50] sm:$0xff]  ;;  %v1710_v41 = vld [vmem:[#allocation5 + $0x68] sm:$0xff] }
 0x321   : > { %1737 = vst [vmem:[%s3158_s3] sm:$0xff] %v1721_v43  ;;  %1738 = vst [vmem:[%s3158_s3 + $0x8] sm:$0xff] %v1722_v51  ;;  %v1724_v55 = vmul.f32 0.33333334, %v1708_v29  ;;  %v1725_v54 = vmul.f32 0.33333334, %v1709_v53  ;;  %v1711_v57 = vld [vmem:[#allocation5 + $0x8] sm:$0xff] }
 0x322   : > { %1739 = vst [vmem:[%s3158_s3 + $0x10] sm:$0xff] %v1723_v52  ;;  %v1726_v56 = vmul.f32 0.33333334, %v1710_v41  ;;  %v1712_v58 = vld [vmem:[#allocation5 + $0x48] sm:$0xff]  ;;  %v1713_v59 = vld [vmem:[#allocation5 + $0x40] sm:$0xff]  ;;  %v1715_v1 = vld [vmem:[#allocation5 + $0x10] sm:$0xff] }
 0x323   : > { %1740 = vst [vmem:[%s3158_s3 + $0x18] sm:$0xff] %v1724_v55  ;;  %1741 = vst [vmem:[%s3158_s3 + $0x20] sm:$0xff] %v1725_v54  ;;  %v1727_v60 = vmul.f32 0.33333334, %v1711_v57  ;;  %v1728_v62 = vmul.f32 0.33333334, %v1712_v58 }
 0x324   : > { %1742 = vst [vmem:[%s3158_s3 + $0x28] sm:$0xff] %v1726_v56  ;;  %v1729_v61 = vmul.f32 0.33333334, %v1713_v59  ;;  %v1714_v0 = vld [vmem:[#allocation5 + $0x20] sm:$0xff]  ;;  %v1716_v2 = vld [vmem:[#allocation5 + $0x38] sm:$0xff]  ;;  %v1718_v30 = vld [vmem:[#allocation5 + $0x70] sm:$0xff] }
 0x325   : > { %1743 = vst [vmem:[%s3158_s3 + $0x30] sm:$0xff] %v1727_v60  ;;  %1744 = vst [vmem:[%s3158_s3 + $0x38] sm:$0xff] %v1728_v62  ;;  %v1730_v63 = vmul.f32 0.33333334, %v1714_v0  ;;  %v1731_v4 = vmul.f32 0.33333334, %v1715_v1 }
 0x326   : > { %1745 = vst [vmem:[%s3158_s3 + $0x40] sm:$0xff] %v1729_v61  ;;  %v1732_v6 = vmul.f32 0.33333334, %v1716_v2  ;;  %v1717_v7 = vld [vmem:[#allocation5 + $0x60] sm:$0xff]  ;;  %v1719_v23 = vld [vmem:[#allocation5 + $0x78] sm:$0xff]  ;;  %v1720_v26 = vld [vmem:[#allocation5 + $0x28] sm:$0xff] }
 0x327   : > { %1746 = vst [vmem:[%s3158_s3 + $0x48] sm:$0xff] %v1730_v63  ;;  %1747 = vst [vmem:[%s3158_s3 + $0x50] sm:$0xff] %v1731_v4  ;;  %v1733_v3 = vmul.f32 0.33333334, %v1717_v7  ;;  %v1734_v5 = vmul.f32 0.33333334, %v1718_v30 }
 0x328   : > { %1748 = vst [vmem:[%s3158_s3 + $0x58] sm:$0xff] %v1732_v6  ;;  %v1735_v39 = vmul.f32 0.33333334, %v1719_v23  ;;  %v1736_v36 = vmul.f32 0.33333334, %v1720_v26 }
 0x329   : > { %1749 = vst [vmem:[%s3158_s3 + $0x60] sm:$0xff] %v1733_v3  ;;  %1750 = vst [vmem:[%s3158_s3 + $0x68] sm:$0xff] %v1734_v5 }
 0x32a   : > { %1751 = vst [vmem:[%s3158_s3 + $0x70] sm:$0xff] %v1735_v39  ;;  %1752 = vst [vmem:[%s3158_s3 + $0x78] sm:$0xff] %v1736_v36 }
 0x32b PF: > { %s15_s17 = sadd.s32 1, %s2410_s17   ;;  %s3160_s15 = smov %s2406_s16 }
 0x32c   : > { %p12_p10 = scmp.ge.s32.totalorder %s15_s17, 5   ;;  %s3161_s16 = smov %s3163_s18 }
 0x32e   :  { %14 = sbr.rel (!%p12_p10) target bundleno = 2 (0x2), region = 126 }

</bundles_post_ra>
